<compile_context>
chip_gen: v6e
topology: v6e:2x2x1
jax: 0.10.0
libtpu: 0.0.40
codegen_flags: <defaults>
</compile_context>

<pallas_src>
import functools

import jax
import jax.numpy as jnp
from jax import lax
from jax.experimental import pallas as pl
from jax.experimental.pallas import tpu as pltpu


# ------------------------------- the kernel -------------------------------

def _respts_kernel(*refs, TB, L, eps, skip_scale, has_shortcut):
    if has_shortcut:
        (x_ref,
         g1_ref, bt1_ref, avg1_ref, w1_ref, b1_ref,
         g2_ref, bt2_ref, avg2_ref, w2_ref, b2_ref,
         wsc_ref, bsc_ref,
         o_ref) = refs
    else:
        (x_ref,
         g1_ref, bt1_ref, avg1_ref, w1_ref, b1_ref,
         g2_ref, bt2_ref, avg2_ref, w2_ref, b2_ref,
         o_ref) = refs

    R = TB * L

    # ---- load + in-kernel transpose to channels-last; stack TB samples on rows ----
    if TB == 1:
        xf = x_ref[0].T.astype(jnp.float32)                       # (L, C_in)
    else:
        xf = jnp.concatenate([x_ref[t].T for t in range(TB)],
                             axis=0).astype(jnp.float32)          # (TB*L, C_in)

    # ---- hoisted per-sample boundary masks for the k=3 conv taps (built once) ----
    pos1 = lax.broadcasted_iota(jnp.int32, (L, 1), 0)             # 0..L-1
    pos = pos1 if TB == 1 else jnp.concatenate([pos1] * TB, axis=0)   # (R, 1)
    not_first = pos != 0          # zero the x[l-1] tap at l == 0   (per sample)
    not_last = pos != (L - 1)     # zero the x[l+1] tap at l == L-1 (per sample)

    def per_sample_sum(h):        # (R, C) -> (TB, C); all-2D sublane reductions
        if TB == 1:
            return jnp.sum(h, axis=0, keepdims=True)
        return jnp.concatenate(
            [jnp.sum(h[t * L:(t + 1) * L], axis=0, keepdims=True) for t in range(TB)],
            axis=0)

    def group_norm_silu(h, gamma, beta, avg):
        # Per-(sample, group) mean/var; group reduce+broadcast folded into the
        # precomposed (C, C) `avg` matrix -> only 2 stat matmuls per GroupNorm.
        s = per_sample_sum(h)                                                 # (TB, C)
        mean = jnp.dot(s, avg, precision=lax.Precision.HIGHEST,
                       preferred_element_type=jnp.float32)                    # (TB, C)
        if TB == 1:
            d = h - mean
        else:
            d = jnp.concatenate(
                [h[t * L:(t + 1) * L] - mean[t:t + 1, :] for t in range(TB)], axis=0)
        ss = per_sample_sum(d * d)                                            # (TB, C)
        var = jnp.dot(ss, avg, precision=lax.Precision.HIGHEST,
                      preferred_element_type=jnp.float32)                     # (TB, C)
        scale = lax.rsqrt(var + eps) * gamma                                  # (TB, C)
        if TB == 1:
            hn = d * scale + beta
            return hn * jax.nn.sigmoid(hn)
        outs = []
        for t in range(TB):
            hn = d[t * L:(t + 1) * L] * scale[t:t + 1, :] + beta
            outs.append(hn * jax.nn.sigmoid(hn))
        return jnp.concatenate(outs, axis=0)

    def conv_k3(h, w_ref, bias):
        # Conv1d(k=3, padding=1), channels-last, 3 bf16 MXU matmuls at M = TB*L.
        # Shifts via pltpu.roll (XLU) on the flat slab, masked at sample boundaries.
        hb = h.astype(jnp.bfloat16)
        hp = jnp.where(not_first, pltpu.roll(h, shift=1, axis=0), 0.0
                       ).astype(jnp.bfloat16)                     # x[l-1] tap
        hn_ = jnp.where(not_last, pltpu.roll(h, shift=R - 1, axis=0), 0.0
                        ).astype(jnp.bfloat16)                    # x[l+1] tap
        y = jnp.dot(hp, w_ref[0], preferred_element_type=jnp.float32)
        y = y + jnp.dot(hb, w_ref[1], preferred_element_type=jnp.float32)
        y = y + jnp.dot(hn_, w_ref[2], preferred_element_type=jnp.float32)
        return y + bias

    # norm1 + SiLU -> conv1 -> norm2 + SiLU -> conv2
    h = group_norm_silu(xf, g1_ref[...], bt1_ref[...], avg1_ref[...])
    h = conv_k3(h, w1_ref, b1_ref[...])                           # (R, C_out)
    h = group_norm_silu(h, g2_ref[...], bt2_ref[...], avg2_ref[...])
    h = conv_k3(h, w2_ref, b2_ref[...])                           # (R, C_out)

    # shortcut (1x1 conv in bf16, or identity) + residual + skip scale
    if has_shortcut:
        sc = jnp.dot(xf.astype(jnp.bfloat16), wsc_ref[...],
                     preferred_element_type=jnp.float32) + bsc_ref[...]
    else:
        sc = xf
    yf = (h + sc) * skip_scale                                    # (R, C_out) f32

    # ---- transpose back to Conv1d layout (C_out, L) per sample and store ----
    for t in range(TB):
        o_ref[t] = yf[t * L:(t + 1) * L, :].T.astype(o_ref.dtype)


# -------------------------------- wrapper ---------------------------------

def _vmem_limit_bytes():
    cap = 64 * 1024 * 1024
    try:
        info = pltpu.get_tpu_info()
        cap = int(getattr(info, "vmem_capacity_bytes", cap))
    except Exception:
        pass
    # headroom under physical VMEM: v7x = 64 MiB, v5e/v6e = 128 MiB
    return 100 * 1024 * 1024 if cap >= 128 * 1024 * 1024 else 48 * 1024 * 1024


def _pick_tb(B, L, C_in, C_out, vmem_limit_bytes):
    cmax = max(C_in, C_out)
    # rough per-sample VMEM bytes: double-buffered in/out blocks + ~10 live f32 temps
    per_sample = 4 * L * (2 * (C_in + C_out) + 10 * cmax)
    budget = vmem_limit_bytes // 3
    best = 1
    for tb in range(1, B + 1):
        if B % tb:
            continue
        if tb > 16 or tb * L > 4096:          # bound unrolling / slab height
            continue
        if tb * per_sample > budget:
            continue
        if B >= 2 and B // tb < 2:            # keep >= 2 grid steps (v7x: 2 TCs)
            continue
        best = tb
    return best


def _group_avg(C, cpg, L):
    # (C, C) matrix composing group-reduce and group-broadcast with the 1/(L*cpg)
    # normalization: mean_c = (per-channel sums) @ avg.
    ch = jnp.arange(C) // cpg
    same = (ch[:, None] == ch[None, :]).astype(jnp.float32)
    return same / float(L * cpg)


def respts_block(
    x_bcl,            # (B, C_in, L)  — PyTorch Conv1d layout
    gamma1, beta1,    # (C_in,)
    w1, b1,           # (C_out, C_in, 3), (C_out,)
    gamma2, beta2,    # (C_out,)
    w2, b2,           # (C_out, C_out, 3), (C_out,)
    w_sc=None, b_sc=None,   # (C_out, C_in, 1), (C_out,)  only if C_in != C_out
    *,
    groups: int,
    eps: float = 1e-5,
    skip_scale: float = 1.0,
):
    B, C_in, L = x_bcl.shape
    C_out = w1.shape[0]
    has_shortcut = (C_in != C_out)   # matches the module: conv shortcut iff in != out
    if has_shortcut:
        assert w_sc is not None and b_sc is not None
    assert C_in % groups == 0 and C_out % groups == 0
    # in-kernel transposes / reshapes assume sublane-aligned dims
    assert L % 8 == 0 and C_in % 8 == 0 and C_out % 8 == 0

    vmem_limit = _vmem_limit_bytes()
    TB = _pick_tb(B, L, C_in, C_out, vmem_limit)

    x = x_bcl.astype(jnp.float32)    # stays in (B, C, L); transposed on-chip

    avg1 = _group_avg(C_in, C_in // groups, L)
    avg2 = _group_avg(C_out, C_out // groups, L)

    # conv weights (C_out, C_in, K) -> (K, C_in, C_out) bf16; biases (1, C_out) f32
    w1_t = jnp.transpose(w1, (2, 1, 0)).astype(jnp.bfloat16)
    w2_t = jnp.transpose(w2, (2, 1, 0)).astype(jnp.bfloat16)
    b1_r = b1.reshape(1, C_out).astype(jnp.float32)
    b2_r = b2.reshape(1, C_out).astype(jnp.float32)

    g1 = gamma1.reshape(1, C_in).astype(jnp.float32)
    bt1 = beta1.reshape(1, C_in).astype(jnp.float32)
    g2 = gamma2.reshape(1, C_out).astype(jnp.float32)
    bt2 = beta2.reshape(1, C_out).astype(jnp.float32)

    args = [x, g1, bt1, avg1, w1_t, b1_r, g2, bt2, avg2, w2_t, b2_r]

    def full(a):
        nd = a.ndim
        return pl.BlockSpec(a.shape, lambda b: (0,) * nd)

    in_specs = [pl.BlockSpec((TB, C_in, L), lambda b: (b, 0, 0))]
    in_specs += [full(a) for a in args[1:]]

    if has_shortcut:
        wsc_t = jnp.transpose(w_sc[:, :, 0], (1, 0)).astype(jnp.bfloat16)  # (C_in, C_out)
        bsc_r = b_sc.reshape(1, C_out).astype(jnp.float32)
        args += [wsc_t, bsc_r]
        in_specs += [full(wsc_t), full(bsc_r)]

    kernel = functools.partial(
        _respts_kernel, TB=TB, L=L, eps=eps,
        skip_scale=skip_scale, has_shortcut=has_shortcut)

    out = pl.pallas_call(
        kernel,
        out_shape=jax.ShapeDtypeStruct((B, C_out, L), jnp.float32),
        grid_spec=pltpu.PrefetchScalarGridSpec(
            num_scalar_prefetch=0,
            grid=(B // TB,),
            in_specs=in_specs,
            out_specs=pl.BlockSpec((TB, C_out, L), lambda b: (b, 0, 0)),
        ),
        compiler_params=pltpu.CompilerParams(
            dimension_semantics=("parallel",),
            vmem_limit_bytes=vmem_limit,
        ),
    )(*args)

    return out   # already in (B, C_out, L)


# ------------------------------ pure-JAX reference ------------------------------

def _reference(x, gamma1, beta1, w1, b1, gamma2, beta2, w2, b2, w_sc, b_sc,
               *, groups, eps, skip_scale):
    def gn(h, gamma, beta):
        B, C, L = h.shape
        hg = h.reshape(B, groups, C // groups, L)
        mean = jnp.mean(hg, axis=(2, 3), keepdims=True)
        var = jnp.mean((hg - mean) ** 2, axis=(2, 3), keepdims=True)
        hn = ((hg - mean) / jnp.sqrt(var + eps)).reshape(B, C, L)
        return hn * gamma[None, :, None] + beta[None, :, None]

    def conv3(h, w, b):
        L = h.shape[-1]
        hp = jnp.pad(h, ((0, 0), (0, 0), (1, 1)))
        y = (jnp.einsum('bcl,dc->bdl', hp[:, :, 0:L], w[:, :, 0]) +
             jnp.einsum('bcl,dc->bdl', hp[:, :, 1:L + 1], w[:, :, 1]) +
             jnp.einsum('bcl,dc->bdl', hp[:, :, 2:L + 2], w[:, :, 2]))
        return y + b[None, :, None]

    res = x
    h = gn(x, gamma1, beta1)
    h = jax.nn.silu(h)
    h = conv3(h, w1, b1)
    h = gn(h, gamma2, beta2)
    h = jax.nn.silu(h)
    h = conv3(h, w2, b2)
    if w_sc is not None:
        res = jnp.einsum('bcl,dc->bdl', res, w_sc[:, :, 0]) + b_sc[None, :, None]
    return (h + res) * skip_scale


if __name__ == "__main__":
    key = jax.random.PRNGKey(0)

    # ---- test 1: C_in != C_out (conv shortcut), TB = 1 path ----
    B, C_in, C_out, L = 2, 32, 64, 64
    groups, eps, skip_scale = 8, 1e-5, 0.7
    ks = jax.random.split(key, 11)
    x = jax.random.normal(ks[0], (B, C_in, L), jnp.float32)
    gamma1 = 1.0 + 0.1 * jax.random.normal(ks[1], (C_in,), jnp.float32)
    beta1 = 0.1 * jax.random.normal(ks[2], (C_in,), jnp.float32)
    w1 = 0.05 * jax.random.normal(ks[3], (C_out, C_in, 3), jnp.float32)
    b1 = 0.02 * jax.random.normal(ks[4], (C_out,), jnp.float32)
    gamma2 = 1.0 + 0.1 * jax.random.normal(ks[5], (C_out,), jnp.float32)
    beta2 = 0.1 * jax.random.normal(ks[6], (C_out,), jnp.float32)
    w2 = 0.05 * jax.random.normal(ks[7], (C_out, C_out, 3), jnp.float32)
    b2 = 0.02 * jax.random.normal(ks[8], (C_out,), jnp.float32)
    w_sc = 0.05 * jax.random.normal(ks[9], (C_out, C_in, 1), jnp.float32)
    b_sc = 0.02 * jax.random.normal(ks[10], (C_out,), jnp.float32)

    out = respts_block(x, gamma1, beta1, w1, b1, gamma2, beta2, w2, b2, w_sc, b_sc,
                       groups=groups, eps=eps, skip_scale=skip_scale)
    out = jax.block_until_ready(out)
    ref = _reference(x, gamma1, beta1, w1, b1, gamma2, beta2, w2, b2, w_sc, b_sc,
                     groups=groups, eps=eps, skip_scale=skip_scale)
    assert out.shape == (B, C_out, L)
    err1 = float(jnp.max(jnp.abs(out - ref)))
    assert err1 < 5e-2, f"test1 max abs err {err1}"

    # ---- test 2: C_in == C_out (identity shortcut), TB > 1 batched path ----
    B2, C2, L2 = 8, 32, 64
    ks = jax.random.split(jax.random.PRNGKey(1), 9)
    x2 = jax.random.normal(ks[0], (B2, C2, L2), jnp.float32)
    g1b = 1.0 + 0.1 * jax.random.normal(ks[1], (C2,), jnp.float32)
    bt1b = 0.1 * jax.random.normal(ks[2], (C2,), jnp.float32)
    w1b = 0.05 * jax.random.normal(ks[3], (C2, C2, 3), jnp.float32)
    b1b = 0.02 * jax.random.normal(ks[4], (C2,), jnp.float32)
    g2b = 1.0 + 0.1 * jax.random.normal(ks[5], (C2,), jnp.float32)
    bt2b = 0.1 * jax.random.normal(ks[6], (C2,), jnp.float32)
    w2b = 0.05 * jax.random.normal(ks[7], (C2, C2, 3), jnp.float32)
    b2b = 0.02 * jax.random.normal(ks[8], (C2,), jnp.float32)

    out2 = respts_block(x2, g1b, bt1b, w1b, b1b, g2b, bt2b, w2b, b2b,
                        groups=groups, eps=eps, skip_scale=1.0)
    out2 = jax.block_until_ready(out2)
    ref2 = _reference(x2, g1b, bt1b, w1b, b1b, g2b, bt2b, w2b, b2b, None, None,
                      groups=groups, eps=eps, skip_scale=1.0)
    assert out2.shape == (B2, C2, L2)
    err2 = float(jnp.max(jnp.abs(out2 - ref2)))
    assert err2 < 5e-2, f"test2 max abs err {err2}"

    print("KERNEL_OK")
</pallas_src>

<mosaic_0001>
module attributes {stable_mosaic.version = 11 : i64} {
  func.func @_respts_kernel(%arg0: i32, %arg1: memref<1x32x64xf32, #tpu.memory_space<vmem>>, %arg2: memref<1x32xf32, #tpu.memory_space<vmem>>, %arg3: memref<1x32xf32, #tpu.memory_space<vmem>>, %arg4: memref<32x32xf32, #tpu.memory_space<vmem>>, %arg5: memref<3x32x64xbf16, #tpu.memory_space<vmem>>, %arg6: memref<1x64xf32, #tpu.memory_space<vmem>>, %arg7: memref<1x64xf32, #tpu.memory_space<vmem>>, %arg8: memref<1x64xf32, #tpu.memory_space<vmem>>, %arg9: memref<64x64xf32, #tpu.memory_space<vmem>>, %arg10: memref<3x64x64xbf16, #tpu.memory_space<vmem>>, %arg11: memref<1x64xf32, #tpu.memory_space<vmem>>, %arg12: memref<32x64xbf16, #tpu.memory_space<vmem>>, %arg13: memref<1x64xf32, #tpu.memory_space<vmem>>, %arg14: memref<1x64x64xf32, #tpu.memory_space<vmem>>) attributes {dimension_semantics = [#tpu.dimension_semantics<parallel>], iteration_bounds = array<i64: 2>, scalar_prefetch = 0 : i64, scratch_operands = 0 : i64, tpu.core_type = #tpu.core_type<tc>, window_params = [{transform_indices = @transform_0, window_bounds = array<i64: 1, 32, 64>}, {pipeline_mode = #tpu.pipeline_mode<synchronous>, transform_indices = @transform_1, window_bounds = array<i64: 1, 32>}, {pipeline_mode = #tpu.pipeline_mode<synchronous>, transform_indices = @transform_2, window_bounds = array<i64: 1, 32>}, {pipeline_mode = #tpu.pipeline_mode<synchronous>, transform_indices = @transform_3, window_bounds = array<i64: 32, 32>}, {pipeline_mode = #tpu.pipeline_mode<synchronous>, transform_indices = @transform_4, window_bounds = array<i64: 3, 32, 64>}, {pipeline_mode = #tpu.pipeline_mode<synchronous>, transform_indices = @transform_5, window_bounds = array<i64: 1, 64>}, {pipeline_mode = #tpu.pipeline_mode<synchronous>, transform_indices = @transform_6, window_bounds = array<i64: 1, 64>}, {pipeline_mode = #tpu.pipeline_mode<synchronous>, transform_indices = @transform_7, window_bounds = array<i64: 1, 64>}, {pipeline_mode = #tpu.pipeline_mode<synchronous>, transform_indices = @transform_8, window_bounds = array<i64: 64, 64>}, {pipeline_mode = #tpu.pipeline_mode<synchronous>, transform_indices = @transform_9, window_bounds = array<i64: 3, 64, 64>}, {pipeline_mode = #tpu.pipeline_mode<synchronous>, transform_indices = @transform_10, window_bounds = array<i64: 1, 64>}, {pipeline_mode = #tpu.pipeline_mode<synchronous>, transform_indices = @transform_11, window_bounds = array<i64: 32, 64>}, {pipeline_mode = #tpu.pipeline_mode<synchronous>, transform_indices = @transform_12, window_bounds = array<i64: 1, 64>}, {transform_indices = @transform_13, window_bounds = array<i64: 1, 64, 64>}]} {
    %c0 = arith.constant 0 : index
    %c0_0 = arith.constant 0 : index
    %c0_1 = arith.constant 0 : index
    %0 = vector.load %arg1[%c0, %c0_0, %c0_1] : memref<1x32x64xf32, #tpu.memory_space<vmem>>, vector<1x32x64xf32>
    %1 = vector.shape_cast %0 : vector<1x32x64xf32> to vector<32x64xf32>
    %2 = tpu.transpose %1, [1, 0] : vector<32x64xf32> -> vector<64x32xf32>
    %3 = tpu.iota {dimensions = array<i32: 0>} : vector<64x1xi32>
    %c0_i32 = arith.constant 0 : i32
    %4 = vector.broadcast %c0_i32 : i32 to vector<64x1xi32>
    %5 = arith.cmpi ne, %3, %4 : vector<64x1xi32>
    %c63_i32 = arith.constant 63 : i32
    %6 = vector.broadcast %c63_i32 : i32 to vector<64x1xi32>
    %7 = arith.cmpi ne, %3, %6 : vector<64x1xi32>
    %c0_2 = arith.constant 0 : index
    %c0_3 = arith.constant 0 : index
    %8 = vector.load %arg2[%c0_2, %c0_3] : memref<1x32xf32, #tpu.memory_space<vmem>>, vector<1x32xf32>
    %c0_4 = arith.constant 0 : index
    %c0_5 = arith.constant 0 : index
    %9 = vector.load %arg3[%c0_4, %c0_5] : memref<1x32xf32, #tpu.memory_space<vmem>>, vector<1x32xf32>
    %c0_6 = arith.constant 0 : index
    %c0_7 = arith.constant 0 : index
    %10 = vector.load %arg4[%c0_6, %c0_7] : memref<32x32xf32, #tpu.memory_space<vmem>>, vector<32x32xf32>
    %cst = arith.constant dense<0.000000e+00> : vector<32xf32>
    %11 = vector.multi_reduction <add>, %2, %cst [0] : vector<64x32xf32> to vector<32xf32>
    %12 = vector.shape_cast %11 : vector<32xf32> to vector<1x32xf32>
    %cst_8 = arith.constant dense<0.000000e+00> : vector<1x32xf32>
    %13 = tpu.matmul %12, %10, %cst_8 {dimension_numbers = #tpu.dot_dimension_numbers<[1], [0], [0], [1], [0, 0, 1, 1], [], []>, precision = #tpu.contract_precision<fp32>} : vector<1x32xf32>, vector<32x32xf32>, vector<1x32xf32> -> vector<1x32xf32>
    %14 = vector.broadcast %13 : vector<1x32xf32> to vector<64x32xf32>
    %15 = arith.subf %2, %14 : vector<64x32xf32>
    %16 = arith.mulf %15, %15 : vector<64x32xf32>
    %cst_9 = arith.constant dense<0.000000e+00> : vector<32xf32>
    %17 = vector.multi_reduction <add>, %16, %cst_9 [0] : vector<64x32xf32> to vector<32xf32>
    %18 = vector.shape_cast %17 : vector<32xf32> to vector<1x32xf32>
    %cst_10 = arith.constant dense<0.000000e+00> : vector<1x32xf32>
    %19 = tpu.matmul %18, %10, %cst_10 {dimension_numbers = #tpu.dot_dimension_numbers<[1], [0], [0], [1], [0, 0, 1, 1], [], []>, precision = #tpu.contract_precision<fp32>} : vector<1x32xf32>, vector<32x32xf32>, vector<1x32xf32> -> vector<1x32xf32>
    %cst_11 = arith.constant 9.99999974E-6 : f32
    %20 = vector.broadcast %cst_11 : f32 to vector<1x32xf32>
    %21 = arith.addf %19, %20 : vector<1x32xf32>
    %22 = math.rsqrt %21 : vector<1x32xf32>
    %23 = arith.mulf %22, %8 : vector<1x32xf32>
    %24 = vector.broadcast %23 : vector<1x32xf32> to vector<64x32xf32>
    %25 = arith.mulf %15, %24 : vector<64x32xf32>
    %26 = vector.broadcast %9 : vector<1x32xf32> to vector<64x32xf32>
    %27 = arith.addf %25, %26 : vector<64x32xf32>
    %28 = arith.negf %27 : vector<64x32xf32>
    %29 = math.exp %28 : vector<64x32xf32>
    %cst_12 = arith.constant 1.000000e+00 : f32
    %30 = vector.broadcast %cst_12 : f32 to vector<64x32xf32>
    %31 = arith.addf %30, %29 : vector<64x32xf32>
    %32 = arith.divf %30, %31 : vector<64x32xf32>
    %33 = arith.mulf %27, %32 : vector<64x32xf32>
    %c0_13 = arith.constant 0 : index
    %c0_14 = arith.constant 0 : index
    %34 = vector.load %arg6[%c0_13, %c0_14] : memref<1x64xf32, #tpu.memory_space<vmem>>, vector<1x64xf32>
    %35 = arith.truncf %33 : vector<64x32xf32> to vector<64x32xbf16>
    %c1_i32 = arith.constant 1 : i32
    %36 = tpu.dynamic_rotate %33 by %c1_i32 dim 0 : vector<64x32xf32>, i32 -> vector<64x32xf32>
    %cst_15 = arith.constant 0.000000e+00 : f32
    %37 = vector.shape_cast %5 : vector<64x1xi1> to vector<64x1xi1>
    %38 = vector.broadcast %37 : vector<64x1xi1> to vector<64x32xi1>
    %39 = vector.broadcast %cst_15 : f32 to vector<64x32xf32>
    %40 = arith.select %38, %36, %39 : vector<64x32xi1>, vector<64x32xf32>
    %41 = arith.truncf %40 : vector<64x32xf32> to vector<64x32xbf16>
    %c63_i32_16 = arith.constant 63 : i32
    %42 = tpu.dynamic_rotate %33 by %c63_i32_16 dim 0 : vector<64x32xf32>, i32 -> vector<64x32xf32>
    %cst_17 = arith.constant 0.000000e+00 : f32
    %43 = vector.shape_cast %7 : vector<64x1xi1> to vector<64x1xi1>
    %44 = vector.broadcast %43 : vector<64x1xi1> to vector<64x32xi1>
    %45 = vector.broadcast %cst_17 : f32 to vector<64x32xf32>
    %46 = arith.select %44, %42, %45 : vector<64x32xi1>, vector<64x32xf32>
    %47 = arith.truncf %46 : vector<64x32xf32> to vector<64x32xbf16>
    %c0_18 = arith.constant 0 : index
    %c0_19 = arith.constant 0 : index
    %c0_20 = arith.constant 0 : index
    %48 = vector.load %arg5[%c0_18, %c0_19, %c0_20] : memref<3x32x64xbf16, #tpu.memory_space<vmem>>, vector<1x32x64xbf16>
    %49 = vector.shape_cast %48 : vector<1x32x64xbf16> to vector<32x64xbf16>
    %cst_21 = arith.constant dense<0.000000e+00> : vector<64x64xf32>
    %50 = tpu.matmul %41, %49, %cst_21 {dimension_numbers = #tpu.dot_dimension_numbers<[1], [0], [0], [1], [0, 0, 1, 1], [], []>} : vector<64x32xbf16>, vector<32x64xbf16>, vector<64x64xf32> -> vector<64x64xf32>
    %c1 = arith.constant 1 : index
    %c0_22 = arith.constant 0 : index
    %c0_23 = arith.constant 0 : index
    %51 = vector.load %arg5[%c1, %c0_22, %c0_23] : memref<3x32x64xbf16, #tpu.memory_space<vmem>>, vector<1x32x64xbf16>
    %52 = vector.shape_cast %51 : vector<1x32x64xbf16> to vector<32x64xbf16>
    %cst_24 = arith.constant dense<0.000000e+00> : vector<64x64xf32>
    %53 = tpu.matmul %35, %52, %cst_24 {dimension_numbers = #tpu.dot_dimension_numbers<[1], [0], [0], [1], [0, 0, 1, 1], [], []>} : vector<64x32xbf16>, vector<32x64xbf16>, vector<64x64xf32> -> vector<64x64xf32>
    %54 = arith.addf %50, %53 : vector<64x64xf32>
    %c2 = arith.constant 2 : index
    %c0_25 = arith.constant 0 : index
    %c0_26 = arith.constant 0 : index
    %55 = vector.load %arg5[%c2, %c0_25, %c0_26] : memref<3x32x64xbf16, #tpu.memory_space<vmem>>, vector<1x32x64xbf16>
    %56 = vector.shape_cast %55 : vector<1x32x64xbf16> to vector<32x64xbf16>
    %cst_27 = arith.constant dense<0.000000e+00> : vector<64x64xf32>
    %57 = tpu.matmul %47, %56, %cst_27 {dimension_numbers = #tpu.dot_dimension_numbers<[1], [0], [0], [1], [0, 0, 1, 1], [], []>} : vector<64x32xbf16>, vector<32x64xbf16>, vector<64x64xf32> -> vector<64x64xf32>
    %58 = arith.addf %54, %57 : vector<64x64xf32>
    %59 = vector.broadcast %34 : vector<1x64xf32> to vector<64x64xf32>
    %60 = arith.addf %58, %59 : vector<64x64xf32>
    %c0_28 = arith.constant 0 : index
    %c0_29 = arith.constant 0 : index
    %61 = vector.load %arg7[%c0_28, %c0_29] : memref<1x64xf32, #tpu.memory_space<vmem>>, vector<1x64xf32>
    %c0_30 = arith.constant 0 : index
    %c0_31 = arith.constant 0 : index
    %62 = vector.load %arg8[%c0_30, %c0_31] : memref<1x64xf32, #tpu.memory_space<vmem>>, vector<1x64xf32>
    %c0_32 = arith.constant 0 : index
    %c0_33 = arith.constant 0 : index
    %63 = vector.load %arg9[%c0_32, %c0_33] : memref<64x64xf32, #tpu.memory_space<vmem>>, vector<64x64xf32>
    %cst_34 = arith.constant dense<0.000000e+00> : vector<64xf32>
    %64 = vector.multi_reduction <add>, %60, %cst_34 [0] : vector<64x64xf32> to vector<64xf32>
    %65 = vector.shape_cast %64 : vector<64xf32> to vector<1x64xf32>
    %cst_35 = arith.constant dense<0.000000e+00> : vector<1x64xf32>
    %66 = tpu.matmul %65, %63, %cst_35 {dimension_numbers = #tpu.dot_dimension_numbers<[1], [0], [0], [1], [0, 0, 1, 1], [], []>, precision = #tpu.contract_precision<fp32>} : vector<1x64xf32>, vector<64x64xf32>, vector<1x64xf32> -> vector<1x64xf32>
    %67 = vector.broadcast %66 : vector<1x64xf32> to vector<64x64xf32>
    %68 = arith.subf %60, %67 : vector<64x64xf32>
    %69 = arith.mulf %68, %68 : vector<64x64xf32>
    %cst_36 = arith.constant dense<0.000000e+00> : vector<64xf32>
    %70 = vector.multi_reduction <add>, %69, %cst_36 [0] : vector<64x64xf32> to vector<64xf32>
    %71 = vector.shape_cast %70 : vector<64xf32> to vector<1x64xf32>
    %cst_37 = arith.constant dense<0.000000e+00> : vector<1x64xf32>
    %72 = tpu.matmul %71, %63, %cst_37 {dimension_numbers = #tpu.dot_dimension_numbers<[1], [0], [0], [1], [0, 0, 1, 1], [], []>, precision = #tpu.contract_precision<fp32>} : vector<1x64xf32>, vector<64x64xf32>, vector<1x64xf32> -> vector<1x64xf32>
    %cst_38 = arith.constant 9.99999974E-6 : f32
    %73 = vector.broadcast %cst_38 : f32 to vector<1x64xf32>
    %74 = arith.addf %72, %73 : vector<1x64xf32>
    %75 = math.rsqrt %74 : vector<1x64xf32>
    %76 = arith.mulf %75, %61 : vector<1x64xf32>
    %77 = vector.broadcast %76 : vector<1x64xf32> to vector<64x64xf32>
    %78 = arith.mulf %68, %77 : vector<64x64xf32>
    %79 = vector.broadcast %62 : vector<1x64xf32> to vector<64x64xf32>
    %80 = arith.addf %78, %79 : vector<64x64xf32>
    %81 = arith.negf %80 : vector<64x64xf32>
    %82 = math.exp %81 : vector<64x64xf32>
    %cst_39 = arith.constant 1.000000e+00 : f32
    %83 = vector.broadcast %cst_39 : f32 to vector<64x64xf32>
    %84 = arith.addf %83, %82 : vector<64x64xf32>
    %85 = arith.divf %83, %84 : vector<64x64xf32>
    %86 = arith.mulf %80, %85 : vector<64x64xf32>
    %c0_40 = arith.constant 0 : index
    %c0_41 = arith.constant 0 : index
    %87 = vector.load %arg11[%c0_40, %c0_41] : memref<1x64xf32, #tpu.memory_space<vmem>>, vector<1x64xf32>
    %88 = arith.truncf %86 : vector<64x64xf32> to vector<64x64xbf16>
    %c1_i32_42 = arith.constant 1 : i32
    %89 = tpu.dynamic_rotate %86 by %c1_i32_42 dim 0 : vector<64x64xf32>, i32 -> vector<64x64xf32>
    %cst_43 = arith.constant 0.000000e+00 : f32
    %90 = vector.shape_cast %5 : vector<64x1xi1> to vector<64x1xi1>
    %91 = vector.broadcast %90 : vector<64x1xi1> to vector<64x64xi1>
    %92 = vector.broadcast %cst_43 : f32 to vector<64x64xf32>
    %93 = arith.select %91, %89, %92 : vector<64x64xi1>, vector<64x64xf32>
    %94 = arith.truncf %93 : vector<64x64xf32> to vector<64x64xbf16>
    %c63_i32_44 = arith.constant 63 : i32
    %95 = tpu.dynamic_rotate %86 by %c63_i32_44 dim 0 : vector<64x64xf32>, i32 -> vector<64x64xf32>
    %cst_45 = arith.constant 0.000000e+00 : f32
    %96 = vector.shape_cast %7 : vector<64x1xi1> to vector<64x1xi1>
    %97 = vector.broadcast %96 : vector<64x1xi1> to vector<64x64xi1>
    %98 = vector.broadcast %cst_45 : f32 to vector<64x64xf32>
    %99 = arith.select %97, %95, %98 : vector<64x64xi1>, vector<64x64xf32>
    %100 = arith.truncf %99 : vector<64x64xf32> to vector<64x64xbf16>
    %c0_46 = arith.constant 0 : index
    %c0_47 = arith.constant 0 : index
    %c0_48 = arith.constant 0 : index
    %101 = vector.load %arg10[%c0_46, %c0_47, %c0_48] : memref<3x64x64xbf16, #tpu.memory_space<vmem>>, vector<1x64x64xbf16>
    %102 = vector.shape_cast %101 : vector<1x64x64xbf16> to vector<64x64xbf16>
    %cst_49 = arith.constant dense<0.000000e+00> : vector<64x64xf32>
    %103 = tpu.matmul %94, %102, %cst_49 {dimension_numbers = #tpu.dot_dimension_numbers<[1], [0], [0], [1], [0, 0, 1, 1], [], []>} : vector<64x64xbf16>, vector<64x64xbf16>, vector<64x64xf32> -> vector<64x64xf32>
    %c1_50 = arith.constant 1 : index
    %c0_51 = arith.constant 0 : index
    %c0_52 = arith.constant 0 : index
    %104 = vector.load %arg10[%c1_50, %c0_51, %c0_52] : memref<3x64x64xbf16, #tpu.memory_space<vmem>>, vector<1x64x64xbf16>
    %105 = vector.shape_cast %104 : vector<1x64x64xbf16> to vector<64x64xbf16>
    %cst_53 = arith.constant dense<0.000000e+00> : vector<64x64xf32>
    %106 = tpu.matmul %88, %105, %cst_53 {dimension_numbers = #tpu.dot_dimension_numbers<[1], [0], [0], [1], [0, 0, 1, 1], [], []>} : vector<64x64xbf16>, vector<64x64xbf16>, vector<64x64xf32> -> vector<64x64xf32>
    %107 = arith.addf %103, %106 : vector<64x64xf32>
    %c2_54 = arith.constant 2 : index
    %c0_55 = arith.constant 0 : index
    %c0_56 = arith.constant 0 : index
    %108 = vector.load %arg10[%c2_54, %c0_55, %c0_56] : memref<3x64x64xbf16, #tpu.memory_space<vmem>>, vector<1x64x64xbf16>
    %109 = vector.shape_cast %108 : vector<1x64x64xbf16> to vector<64x64xbf16>
    %cst_57 = arith.constant dense<0.000000e+00> : vector<64x64xf32>
    %110 = tpu.matmul %100, %109, %cst_57 {dimension_numbers = #tpu.dot_dimension_numbers<[1], [0], [0], [1], [0, 0, 1, 1], [], []>} : vector<64x64xbf16>, vector<64x64xbf16>, vector<64x64xf32> -> vector<64x64xf32>
    %111 = arith.addf %107, %110 : vector<64x64xf32>
    %112 = vector.broadcast %87 : vector<1x64xf32> to vector<64x64xf32>
    %113 = arith.addf %111, %112 : vector<64x64xf32>
    %114 = arith.truncf %2 : vector<64x32xf32> to vector<64x32xbf16>
    %c0_58 = arith.constant 0 : index
    %c0_59 = arith.constant 0 : index
    %115 = vector.load %arg12[%c0_58, %c0_59] : memref<32x64xbf16, #tpu.memory_space<vmem>>, vector<32x64xbf16>
    %cst_60 = arith.constant dense<0.000000e+00> : vector<64x64xf32>
    %116 = tpu.matmul %114, %115, %cst_60 {dimension_numbers = #tpu.dot_dimension_numbers<[1], [0], [0], [1], [0, 0, 1, 1], [], []>} : vector<64x32xbf16>, vector<32x64xbf16>, vector<64x64xf32> -> vector<64x64xf32>
    %c0_61 = arith.constant 0 : index
    %c0_62 = arith.constant 0 : index
    %117 = vector.load %arg13[%c0_61, %c0_62] : memref<1x64xf32, #tpu.memory_space<vmem>>, vector<1x64xf32>
    %118 = vector.broadcast %117 : vector<1x64xf32> to vector<64x64xf32>
    %119 = arith.addf %116, %118 : vector<64x64xf32>
    %120 = arith.addf %113, %119 : vector<64x64xf32>
    %cst_63 = arith.constant 0.699999988 : f32
    %121 = vector.broadcast %cst_63 : f32 to vector<64x64xf32>
    %122 = arith.mulf %120, %121 : vector<64x64xf32>
    %123 = tpu.transpose %122, [1, 0] : vector<64x64xf32> -> vector<64x64xf32>
    %c0_64 = arith.constant 0 : index
    %c0_65 = arith.constant 0 : index
    %c0_66 = arith.constant 0 : index
    %124 = vector.load %arg14[%c0_64, %c0_65, %c0_66] : memref<1x64x64xf32, #tpu.memory_space<vmem>>, vector<1x64x64xf32>
    %125 = vector.shape_cast %124 : vector<1x64x64xf32> to vector<64x64xf32>
    %126 = vector.shape_cast %123 : vector<64x64xf32> to vector<1x64x64xf32>
    tpu.vector_store %arg14[%c0_64, %c0_65, %c0_66], %126 {strides = array<i32>} : memref<1x64x64xf32, #tpu.memory_space<vmem>>, vector<1x64x64xf32>,
    return
  }
  func.func @transform_0(%arg0: i32) -> (i32, i32, i32) {
    %c0_i32 = arith.constant 0 : i32
    %c0_i32_0 = arith.constant 0 : i32
    %c0_i32_1 = arith.constant 0 : i32
    return %arg0, %c0_i32, %c0_i32_0 : i32, i32, i32
  }
  func.func @transform_1(%arg0: i32) -> (i32, i32) {
    %c0_i32 = arith.constant 0 : i32
    %c0_i32_0 = arith.constant 0 : i32
    %c0_i32_1 = arith.constant 0 : i32
    return %c0_i32, %c0_i32_0 : i32, i32
  }
  func.func @transform_2(%arg0: i32) -> (i32, i32) {
    %c0_i32 = arith.constant 0 : i32
    %c0_i32_0 = arith.constant 0 : i32
    %c0_i32_1 = arith.constant 0 : i32
    return %c0_i32, %c0_i32_0 : i32, i32
  }
  func.func @transform_3(%arg0: i32) -> (i32, i32) {
    %c0_i32 = arith.constant 0 : i32
    %c0_i32_0 = arith.constant 0 : i32
    %c0_i32_1 = arith.constant 0 : i32
    return %c0_i32, %c0_i32_0 : i32, i32
  }
  func.func @transform_4(%arg0: i32) -> (i32, i32, i32) {
    %c0_i32 = arith.constant 0 : i32
    %c0_i32_0 = arith.constant 0 : i32
    %c0_i32_1 = arith.constant 0 : i32
    %c0_i32_2 = arith.constant 0 : i32
    return %c0_i32, %c0_i32_0, %c0_i32_1 : i32, i32, i32
  }
  func.func @transform_5(%arg0: i32) -> (i32, i32) {
    %c0_i32 = arith.constant 0 : i32
    %c0_i32_0 = arith.constant 0 : i32
    %c0_i32_1 = arith.constant 0 : i32
    return %c0_i32, %c0_i32_0 : i32, i32
  }
  func.func @transform_6(%arg0: i32) -> (i32, i32) {
    %c0_i32 = arith.constant 0 : i32
    %c0_i32_0 = arith.constant 0 : i32
    %c0_i32_1 = arith.constant 0 : i32
    return %c0_i32, %c0_i32_0 : i32, i32
  }
  func.func @transform_7(%arg0: i32) -> (i32, i32) {
    %c0_i32 = arith.constant 0 : i32
    %c0_i32_0 = arith.constant 0 : i32
    %c0_i32_1 = arith.constant 0 : i32
    return %c0_i32, %c0_i32_0 : i32, i32
  }
  func.func @transform_8(%arg0: i32) -> (i32, i32) {
    %c0_i32 = arith.constant 0 : i32
    %c0_i32_0 = arith.constant 0 : i32
    %c0_i32_1 = arith.constant 0 : i32
    return %c0_i32, %c0_i32_0 : i32, i32
  }
  func.func @transform_9(%arg0: i32) -> (i32, i32, i32) {
    %c0_i32 = arith.constant 0 : i32
    %c0_i32_0 = arith.constant 0 : i32
    %c0_i32_1 = arith.constant 0 : i32
    %c0_i32_2 = arith.constant 0 : i32
    return %c0_i32, %c0_i32_0, %c0_i32_1 : i32, i32, i32
  }
  func.func @transform_10(%arg0: i32) -> (i32, i32) {
    %c0_i32 = arith.constant 0 : i32
    %c0_i32_0 = arith.constant 0 : i32
    %c0_i32_1 = arith.constant 0 : i32
    return %c0_i32, %c0_i32_0 : i32, i32
  }
  func.func @transform_11(%arg0: i32) -> (i32, i32) {
    %c0_i32 = arith.constant 0 : i32
    %c0_i32_0 = arith.constant 0 : i32
    %c0_i32_1 = arith.constant 0 : i32
    return %c0_i32, %c0_i32_0 : i32, i32
  }
  func.func @transform_12(%arg0: i32) -> (i32, i32) {
    %c0_i32 = arith.constant 0 : i32
    %c0_i32_0 = arith.constant 0 : i32
    %c0_i32_1 = arith.constant 0 : i32
    return %c0_i32, %c0_i32_0 : i32, i32
  }
  func.func @transform_13(%arg0: i32) -> (i32, i32, i32) {
    %c0_i32 = arith.constant 0 : i32
    %c0_i32_0 = arith.constant 0 : i32
    %c0_i32_1 = arith.constant 0 : i32
    return %arg0, %c0_i32, %c0_i32_0 : i32, i32, i32
  }
}

</mosaic_0001>

<bundles_post_ra>
// kernel: tpu_custom_call.1
= control target key start
LH: loop header
LB: loop body
LE: loop exit
PB: predicated region body
PF: predicated region fallthrough
CT: control target
= control target key end

     0   :  { %s6512_s0 = inlined_call_operand.hbm [shape: f32[2,32,64], index: 0, kind: input, shape index: {}]   ;;  %s6513_s1 = inlined_call_operand.vmem [shape: f32[1,32], index: 1, kind: input, shape index: {}]   ;;  %s6514_s2 = inlined_call_operand.vmem [shape: f32[1,32], index: 2, kind: input, shape index: {}]   ;;  %s6515_s3 = inlined_call_operand.hbm [shape: f32[32,32], index: 3, kind: input, shape index: {}]   ;;  %s6516_s4 = inlined_call_operand.hbm [shape: bf16[3,32,64], index: 4, kind: input, shape index: {}]   ;;  %s6517_s5 = inlined_call_operand.vmem [shape: f32[1,64], index: 5, kind: input, shape index: {}]   ;;  %s6518_s6 = inlined_call_operand.vmem [shape: f32[1,64], index: 6, kind: input, shape index: {}]   ;;  %s6519_s7 = inlined_call_operand.hbm [shape: f32[1,64], index: 7, kind: input, shape index: {}]   ;;  %s6520_s8 = inlined_call_operand.hbm [shape: f32[64,64], index: 8, kind: input, shape index: {}]   ;;  %s6521_s9 = inlined_call_operand.hbm [shape: bf16[3,64,64], index: 9, kind: input, shape index: {}]   ;;  %s6522_s10 = inlined_call_operand.hbm [shape: f32[1,64], index: 10, kind: input, shape index: {}]   ;;  %s6523_s11 = inlined_call_operand.vmem [shape: bf16[32,64], index: 11, kind: input, shape index: {}]   ;;  %s6524_s12 = inlined_call_operand.vmem [shape: f32[1,64], index: 12, kind: input, shape index: {}]   ;;  %s6525_s13 = inlined_call_operand.hbm [shape: f32[2,64,64], index: 13, kind: output, shape index: {}]  }
   0x1   :  { %6546 = sst [smem:[#allocation30_spill]] %s6515_s3 }
   0x2   :  { %6547 = sst [smem:[#allocation31_spill]] %s6516_s4 }
   0x3   :  { %6548 = sst [smem:[#allocation32_spill]] %s6519_s7 }
   0x4   :  { %6549 = sst [smem:[#allocation33_spill]] %s6520_s8 }
   0x5   :  { %6550 = sst [smem:[#allocation34_spill]] %s6521_s9 }
   0x6   :  { %6551 = sst [smem:[#allocation35_spill]] %s6522_s10 }
   0x7   :  { %6552 = sst [smem:[#allocation36_spill]] %s6524_s12 }
   0x8   :  { %6553 = sst [smem:[#allocation37_spill]] %s6525_s13 }
   0x9   :  { %18 = vsyncpa [#allocation3], 0 }
   0xa   :  { %20 = vsyncpa [#allocation3 + $0x1], 0 }
   0xb   :  { %21 = vsyncpa [#allocation6], 0 }
   0xc   :  { %22 = vsyncpa [#allocation9], 0 }
   0xd   :  { %23 = vsyncpa [#allocation12], 0 }
   0xe   :  { %24 = vsyncpa [#allocation4], 0 }
   0xf   :  { %26 = vsyncpa [#allocation4 + $0x1], 0  ;;  %s5404_s25 = smov 0   ;;  %s5406_s26 = smov 0  }
  0x10   :  { %s5408_s27 = smov 0   ;;  %s5410_s28 = smov 0  }
  0x11 LB: > { %s5318_s29 = smov [#allocation5]   ;;  %s5425_s14 = sadd.s32 4294967295, %s5316_s28   ;;  %s5316_s28 = sphi %s5410_s28, %s6608_s28   ;;  %s5312_s27 = sphi %s5408_s27, %s6607_s27   ;;  %s5308_s26 = sphi %s5406_s26, %s6606_s26   ;;  %s5304_s25 = sphi %s5404_s25, %s6605_s25  }
  0x12   : > { %s359_s30 = sshll.u32 %s5318_s29, 4  ;;  %p4085_p0 = scmp.ge.s32.totalorder %s5316_s28, 1  ;;  %s360_s30 = int_to_ptr.vmem [resolvable:$true] %s359_s30 }
  0x13   : > { %p6527_p1 = scmp.eq.s32.totalorder %s5425_s14, 0  ;;  %p341_p2 = scmp.lt.s32.totalorder %s5316_s28, 3 }
  0x14   : > { %s5319_s16 = smov [#allocation8]   ;;  %s5320_s19 = smov [#allocation11]  }
  0x15   : > { %p5430_p3 = pnand %p4085_p0, %p341_p2  ;;  %s392_s17 = sshll.u32 %s5319_s16, 4  ;;  %s393_s17 = int_to_ptr.vmem [resolvable:$true] %s392_s17 }
  0x16   : > { %s415_s20 = sshll.u32 %s5320_s19, 4  ;;  %s5067_s22 = scalar_lea.vmem %s360_s30, 512  ;;  %s416_s20 = int_to_ptr.vmem [resolvable:$true] %s415_s20 }
  0x17   : > { %s6554_s15 = scalar_select %p5430_p3, 1, 0 }
  0x18   : > { %p4881_p5 = pneg %p5430_p3  ;;  %p5068_p8 = scmp.ne.s32.totalorder %s360_s30, %s5067_s22 }
  0x19   : > { %p5075_p11 = scmp.lt.s32.totalorder %s360_s30, %s360_s30  ;;  %p5076_p12 = scmp.lt.s32.totalorder %s5067_s22, %s5067_s22 }
  0x1a   : > { %p5439_p6 = pnand %p4881_p5, %p6527_p1 }
  0x1b   : > { %p5077_p13 = por %p5076_p12, %p5075_p11 }
  0x1c   : > { %p5445_p7 = pneg %p5439_p6 }
  0x1e   : > { %p5070_p9 = pnand %p5068_p8, %p5445_p7 }
  0x20   : > { %p5071_p10 = pneg %p5070_p9 }
  0x22   : > { %p5078_p0 = pnand %p5077_p13, %p5071_p10 }
  0x24   : > { %5081 = shalt.err (!%p5078_p0)
}
  0x25   : > { %s6529_s23 = smov 128   ;;  %s6531_s24 = smov 8  }
  0x26   : > { %s6557_s3 = sld [smem:[#allocation30_spill]]  ;;  %s5093_s19 = scalar_lea.vmem %s393_s17, 16 }
  0x27   : > { %p5094_p2 = scmp.ne.s32.totalorder %s393_s17, %s5093_s19  ;;  %s5100_s22 = scalar_lea.vmem %s393_s17, 32 }
  0x28   : > { %p5101_p9 = scmp.lt.s32.totalorder %s393_s17, %s393_s17  ;;  %p5102_p10 = scmp.lt.s32.totalorder %s5100_s22, %s5093_s19 }
  0x29   : > { %p5096_p5 = pnand %p5094_p2, %p5445_p7 }
  0x2a   : > { %p5103_p11 = por %p5102_p10, %p5101_p9 }
  0x2b   : > { %p5097_p8 = pneg %p5096_p5 }
  0x2c   : > { %4884 = dma.hbm_to_vmem [thread:$0]  (!%p5439_p6), %s6557_s3, 512, %s360_s30, [#allocation6], %s6529_s23, %s6529_s23, %s6531_s24  }
  0x2d   : > { %p5104_p12 = pnand %p5103_p11, %p5097_p8 }
  0x2f   : > { %5107 = shalt.err (!%p5104_p12)
}
  0x30   : > { %s6558_s7 = sld [smem:[#allocation32_spill]]  ;;  %s5119_s30 = scalar_lea.vmem %s416_s20, 1536 }
  0x31   : > { %p5120_p13 = scmp.ne.s32.totalorder %s416_s20, %s5119_s30  ;;  %p5127_p5 = scmp.lt.s32.totalorder %s416_s20, %s416_s20 }
  0x32   : > { %p5128_p4 = scmp.lt.s32.totalorder %s5119_s30, %s5119_s30 }
  0x33   : > { %p5122_p0 = pnand %p5120_p13, %p5445_p7 }
  0x34   : > { %p5129_p1 = por %p5128_p4, %p5127_p5 }
  0x35   : > { %p5123_p2 = pneg %p5122_p0 }
  0x36   : > { %4890 = dma.hbm_to_vmem [thread:$0]  (!%p5439_p6), %s6558_s7, 16, %s393_s17, [#allocation9]  }
  0x37   : > { %p5130_p3 = pnand %p5129_p1, %p5123_p2 }
  0x39   : > { %5133 = shalt.err (!%p5130_p3)
}
  0x3a   : > { %s5323_s29 = smov 64   ;;  %s5324_s16 = smov 4  }
  0x3b   : > { %s6559_s9 = sld [smem:[#allocation34_spill]]  ;;  %s5325_s13 = smov [#allocation7]  }
  0x3c   : > { %s372_s17 = sshll.u32 %s5325_s13, 4  ;;  %s5326_s22 = smov [#allocation10]   ;;  %s373_s17 = int_to_ptr.vmem [resolvable:$true] %s372_s17 }
  0x3d   : > { %s402_s23 = sshll.u32 %s5326_s22, 4  ;;  %s5145_s24 = scalar_lea.vmem %s373_s17, 768  ;;  %s403_s23 = int_to_ptr.vmem [resolvable:$true] %s402_s23 }
  0x3e   : > { %p5146_p8 = scmp.ne.s32.totalorder %s373_s17, %s5145_s24  ;;  %p5153_p3 = scmp.lt.s32.totalorder %s373_s17, %s373_s17 }
  0x3f   : > { %p5154_p9 = scmp.lt.s32.totalorder %s5145_s24, %s5145_s24 }
  0x40   : > { %p5148_p4 = pnand %p5146_p8, %p5445_p7 }
  0x41   : > { %4896 = dma.hbm_to_vmem [thread:$0]  (!%p5439_p6), %s6559_s9, 1536, %s416_s20, [#allocation12], %s5323_s29, %s5323_s29, %s5324_s16  }
  0x42   : > { %p5149_p1 = pneg %p5148_p4  ;;  %p5155_p10 = por %p5154_p9, %p5153_p3 }
  0x44   : > { %p5156_p11 = pnand %p5155_p10, %p5149_p1 }
  0x46   : > { %5159 = shalt.err (!%p5156_p11)
}
  0x47   : > { %s6560_s4 = sld [smem:[#allocation31_spill]]  ;;  %s5171_s20 = scalar_lea.vmem %s403_s23, 1024 }
  0x48   : > { %p5172_p12 = scmp.ne.s32.totalorder %s403_s23, %s5171_s20  ;;  %p5179_p2 = scmp.lt.s32.totalorder %s403_s23, %s403_s23 }
  0x49   : > { %p5180_p5 = scmp.lt.s32.totalorder %s5171_s20, %s5171_s20 }
  0x4a   : > { %p5174_p13 = pnand %p5172_p12, %p5445_p7 }
  0x4b   : > { %p5181_p8 = por %p5180_p5, %p5179_p2 }
  0x4c   : > { %p5175_p0 = pneg %p5174_p13 }
  0x4d   : > { %4887 = dma.hbm_to_vmem [thread:$0]  (!%p5439_p6), %s6560_s4, 768, %s373_s17, [#allocation6], %s5323_s29, %s5323_s29, %s5324_s16  }
  0x4e   : > { %p5182_p4 = pnand %p5181_p8, %p5175_p0 }
  0x50   : > { %5185 = shalt.err (!%p5182_p4)
}
  0x51   : > { %s6561_s24 = smov 8   ;;  %s6562_s12 = smov 128  }
  0x52   : > { %s6563_s8 = sld [smem:[#allocation33_spill]]  ;;  %s5327_s29 = smov [#allocation13]  }
  0x53   : > { %s429_s16 = sshll.u32 %s5327_s29, 4  ;;  %s430_s16 = int_to_ptr.vmem [resolvable:$true] %s429_s16 }
  0x54   : > { %s5197_s17 = scalar_lea.vmem %s430_s16, 16  ;;  %s5204_s30 = scalar_lea.vmem %s430_s16, 32 }
  0x55   : > { %p5198_p1 = scmp.ne.s32.totalorder %s430_s16, %s5197_s17  ;;  %p5205_p10 = scmp.lt.s32.totalorder %s430_s16, %s430_s16 }
  0x56   : > { %p5206_p11 = scmp.lt.s32.totalorder %s5204_s30, %s5197_s17 }
  0x57   : > { %p5200_p3 = pnand %p5198_p1, %p5445_p7 }
  0x58   : > { %4893 = dma.hbm_to_vmem [thread:$0]  (!%p5439_p6), %s6563_s8, 1024, %s403_s23, [#allocation9], %s6562_s12, %s6562_s12, %s6561_s24  }
  0x59   : > { %p5201_p9 = pneg %p5200_p3  ;;  %p5207_p12 = por %p5206_p11, %p5205_p10 }
  0x5b   : > { %p5208_p13 = pnand %p5207_p12, %p5201_p9 }
  0x5d   : > { %5211 = shalt.err (!%p5208_p13)
}
  0x5e   : > { %s6564_s10 = sld [smem:[#allocation35_spill]]  ;;  %s4084_s21 = sadd.s32 4294967294, %s5316_s28  }
  0x5f   : > { %s5499_s18 = sadd.s32 1, %s5316_s28   ;;  %s39_s13 = sadd.s32 1, %s5312_s27 }
  0x60   : > { %s36_s23 = ssub.s32 %s5316_s28, %s5499_s18  ;;  %p46_p0 = scmp.ne.s32.totalorder %s5312_s27, %s5308_s26 }
  0x61   : > { %p37_p7 = scmp.eq.s32.totalorder %s36_s23, 0  ;;  %p47_p2 = scmp.eq.s32.totalorder %s5316_s28, 0 }
  0x62   : > { %p52_p5 = scmp.ne.s32.totalorder %s5308_s26, %s5304_s25  ;;  %p6567_p4 = scmp.eq.s32.totalorder %s5425_s14, 0 }
  0x63   : > { %s5510_s22 = scalar_select %p37_p7, %s5312_s27, %s39_s13  }
  0x64   : > { %4899 = dma.hbm_to_vmem [thread:$0]  (!%p5439_p6), %s6564_s10, 16, %s430_s16, [#allocation12]  }
  0x65   : > { %6565 = sst [smem:[#allocation20_spill]] %s5510_s22  ;;  %p5512_p8 = por %p47_p2, %p46_p0 }
  0x66   : > { %p5518_p6 = por %p6567_p4, %p52_p5  ;;  %p328_p1 = scmp.eq.s32.totalorder %s5425_s14, 1 }
  0x67   : > { %p334_p3 = scmp.eq.s32.totalorder %s4084_s21, 1  ;;  %p4914_p9 = scmp.lt.s32.totalorder %s5316_s28, 2 }
  0x68   : > { %s6568_s16 = scalar_select %p5518_p6, 1, 0 }
  0x69   : > { %s446_s17 = sand.u32 1, %s5312_s27   ;;  %p5525_p10 = por %p328_p1, %p46_p0 }
  0x6a   : > { %p5529_p11 = por %p334_p3, %p52_p5  ;;  %s4093_s20 = sshll.u32 %s446_s17, 5 }
  0x6b   : > { %s6569_s30 = scalar_select %p5525_p10, 1, 0 }
  0x6c   : > { %s6570_s19 = scalar_select %p5529_p11, 1, 0 }
  0x6d   : > { %s4179_s23 = sshll.u32 %s5316_s28, 9  ;;  %s450_s21 = scalar_lea.vmem [#allocation2], %s4093_s20 }
  0x6e   : > { %s5537_s4 = scalar_lea.hbm %s6512_s0, %s4179_s23  ;;  %s457_s7 = sshll.u32 %s450_s21, 4  ;;  %s5539_s7 = int_to_ptr.vmem [resolvable:$true] %s457_s7 }
  0x6f   : > { %p5543_p12 = pnand %p4914_p9, %p5512_p8  ;;  %s5547_s9 = scalar_lea.sflag [#allocation3], %s446_s17 }
  0x70   : > { %s5212_s10 = scalar_lea.hbm %s5537_s4, 512  ;;  %s5217_s20 = scalar_lea.hbm %s6512_s0, 1024 }
  0x71   : > { %p5213_p13 = scmp.ne.s32.totalorder %s5537_s4, %s5212_s10  ;;  %p5214_p7 = pneg %p5543_p12 }
  0x72   : > { %p5218_p5 = scmp.lt.s32.totalorder %s5537_s4, %s6512_s0  ;;  %p5219_p8 = scmp.lt.s32.totalorder %s5217_s20, %s5212_s10 }
  0x73   : > { %p5215_p0 = pnand %p5214_p7, %p5213_p13 }
  0x74   : > { %p5220_p4 = por %p5219_p8, %p5218_p5 }
  0x75   : > { %p5216_p2 = pneg %p5215_p0 }
  0x77   : > { %p5221_p1 = pnand %p5220_p4, %p5216_p2 }
  0x79   : > { %5224 = shalt.err (!%p5221_p1)
}
  0x7a   : > { %s5225_s29 = scalar_lea.vmem %s5539_s7, 512  ;;  %s5328_s17 = smov [#allocation2]  }
  0x7b   : > { %p5226_p3 = scmp.ne.s32.totalorder %s5539_s7, %s5225_s29  ;;  %s5230_s22 = sshll.u32 %s5328_s17, 4  ;;  %s5231_s22 = int_to_ptr.vmem [resolvable:$false] %s5230_s22 }
  0x7c   : > { %s5232_s3 = scalar_lea.vmem %s5231_s22, 1024  ;;  %p5233_p0 = scmp.lt.s32.totalorder %s5539_s7, %s5231_s22 }
  0x7d   : > { %p5228_p9 = pnand %p5226_p3, %p5214_p7  ;;  %p5234_p11 = scmp.lt.s32.totalorder %s5232_s3, %s5225_s29 }
  0x7f   : > { %p5229_p13 = pneg %p5228_p9  ;;  %p5235_p10 = por %p5234_p11, %p5233_p0 }
  0x81   : > { %p5236_p6 = pnand %p5235_p10, %p5229_p13 }
  0x83   : > { %5239 = shalt.err (!%p5236_p6)
}
  0x84   : > { %4903 = dma.hbm_to_vmem [thread:$0]  (!%p5543_p12), %s5537_s4, 512, %s5539_s7, %s5547_s9, %s6562_s12, %s6562_s12, %s6561_s24  }
  0x85   : > { %p6572_p7 = scmp.ne.s32.totalorder %s6554_s15, 0 }
  0x87   : > { %469 = sbr.rel (%p6572_p7) target bundleno = 2089 (0x829), region = 72 }
  0x8c   : > { %s5574_s10 = sand.u32 1, %s5308_s26   ;;  %p6573_p6 = scmp.ne.s32.totalorder %s6568_s16, 0 }
  0x8d   : > { %s4097_s22 = sshll.u32 %s5574_s10, 5  ;;  %s472_s23 = scalar_lea.sflag [#allocation3], %s5574_s10 }
  0x8e   : > { %s475_s20 = scalar_lea.vmem [#allocation2], %s4097_s22 }
  0x8f   : > { %5283 = dma.done.wait (%p6573_p6), %s472_s23, 512  }
  0x90   : > { %5285 = vsyncadd (%p6573_p6), %s472_s23, 4294966784  ;;  %p6574_p10 = scmp.eq.s32.totalorder %s5425_s14, 0 }
  0x92   : > { %5287 = dma.done.wait (%p6574_p10), [#allocation6], 1280   ;;  %p6575_p11 = pmov %p6574_p10 }
  0x93   : > { %p6576_p12 = pmov %p6574_p10 }
  0x94   : > { %5289 = vsyncadd (%p6575_p11), [#allocation6], 4294966016 }
  0x95   : > { %5291 = dma.done.wait (%p6576_p12), [#allocation9], 1040   ;;  %p6577_p2 = pmov %p6574_p10 }
  0x97   : > { %5293 = vsyncadd (%p6577_p2), [#allocation9], 4294966256  ;;  %p6578_p5 = pmov %p6577_p2 }
  0x98   : > { %p6579_p8 = pmov %p6577_p2 }
  0x99   : > { %5295 = dma.done.wait (%p6578_p5), [#allocation12], 1552  }
  0x9a   : > { %5297 = vsyncadd (%p6579_p8), [#allocation12], 4294965744  ;;  %v543_v0 = vld [vmem:[%s475_s20] sm:$0xff]  ;;  %v544_v1 = vld [vmem:[%s475_s20 + $0x8] sm:$0xff]  ;;  %v6535_v9 = vmov 0.0   ;;  %vm5330_vm0 = vmmov 0  }
  0x9b   : > { %547 = vxpose.xlu0.b32.start [1/4] (short) (narrow) %v543_v0, 64  ;;  %v545_v2 = vld [vmem:[%s475_s20 + $0x10] sm:$0xff]  ;;  %v546_v3 = vld [vmem:[%s475_s20 + $0x18] sm:$0xff]  ;;  %4419 = vmatprep.subr.mxu0 %v6535_v9  ;;  %v607_v10 = vld [vmem:[#allocation5 + $0x8] sm:$0xff]  ;;  %vm610_vm1 = vcmask 261120   ;;  %vm2141_vm6 = vcmask 523264  }
  0x9c   : > { %v609_v4 = vld [vmem:[#allocation5 + $0x18] sm:$0xff]  ;;  %v608_v6 = vld [vmem:[#allocation5 + $0x10] sm:$0xff]  ;;  %4397 = vmatprep.subr.mxu1 %v6535_v9  ;;  %v606_v11 = vld [vmem:[#allocation5] sm:$0xff]  ;;  %v5607_v13 = vand.u32 4294901760, %v607_v10  ;;  %4427 = vmatprep.mubr.msk.f32.mxu0 %vm5330_vm0, %v6535_v9  ;;  %s6599_s23 = sld [smem:[#allocation36_spill]]  ;;  %s4104_s20 = sshll.u32 %s5574_s10, 6 }
  0x9d   : > { %v5594_v5 = vand.u32 4294901760, %v609_v4  ;;  %v5599_v8 = vand.u32 4294901760, %v608_v6  ;;  %v5610_v14 = vand.u32 4294901760, %v606_v11  ;;  %4405 = vmatprep.mubr.msk.f32.mxu1 %vm5330_vm0, %v6535_v9  ;;  %s541_s4 = scalar_lea.vmem [#allocation14], %s4104_s20  ;;  %s4180_s8 = sshll.u32 %s5425_s14, 10 }
  0x9e   : > { %v5616_v15 = vsub.f32 %v607_v10, %v5607_v13  ;;  %s3954_s7 = sshll.u32 %s541_s4, 4  ;;  %s6600_s24 = sld [smem:[#allocation37_spill]]  ;;  %s6462_s7 = int_to_ptr.vmem [resolvable:$true] %s3954_s7 }
  0x9f   : > { %548 = vxpose.xlu0.b32.cont [2/4] (short) (narrow) %v544_v1, 64  ;;  %v5597_v7 = vsub.f32 %v609_v4, %v5594_v5  ;;  %v5605_v12 = vsub.f32 %v608_v6, %v5599_v8  ;;  %4398 = vmatpush3.msra.mxu1 %v5594_v5  ;;  %v5619_v16 = vsub.f32 %v606_v11, %v5610_v14  ;;  %s3941_s16 = scalar_lea.sflag [#allocation4], %s5574_s10  ;;  %s5240_s13 = scalar_lea.vmem %s6462_s7, 1024 }
  0xa0   : > { %4399 = vmatprep.subr.mxu1 %v6535_v9  ;;  %v5682_v53 = vand.u32 4294901760, %v5616_v15  ;;  %p5241_p4 = scmp.ne.s32.totalorder %s6462_s7, %s5240_s13  ;;  %p6601_p1 = scmp.ne.s32.totalorder %s6569_s30, 0 }
  0xa1   : > { %4420 = vmatpush3.msra.mxu0 %v5597_v7  ;;  %4400 = vmatpush3.msra.mxu1 %v5599_v8  ;;  %v5672_v48 = vand.u32 4294901760, %v5597_v7  ;;  %v5676_v50 = vand.u32 4294901760, %v5605_v12  ;;  %v5691_v57 = vand.u32 4294901760, %v5619_v16  ;;  %s5331_s14 = smov [#allocation14]  }
  0xa2   : > { %4421 = vmatprep.subr.mxu0 %v6535_v9  ;;  %4401 = vmatprep.subr.mxu1 %v6535_v9  ;;  %v756_v58 = vsub.f32 %v5616_v15, %v5682_v53  ;;  %p5242_p3 = pnand %p5241_p4, %p6601_p1  ;;  %s5244_s21 = sshll.u32 %s5331_s14, 4  ;;  %s5245_s21 = int_to_ptr.vmem [resolvable:$false] %s5244_s21 }
  0xa3   : > { %549 = vxpose.xlu0.b32.cont [3/4] (short) (narrow) %v545_v2, 64  ;;  %4422 = vmatpush3.msra.mxu0 %v5605_v12  ;;  %v742_v51 = vsub.f32 %v5597_v7, %v5672_v48  ;;  %v749_v54 = vsub.f32 %v5605_v12, %v5676_v50  ;;  %v763_v61 = vsub.f32 %v5619_v16, %v5691_v57  ;;  %s5246_s29 = scalar_lea.vmem %s5245_s21, 2048  ;;  %p5247_p13 = scmp.lt.s32.totalorder %s6462_s7, %s5245_s21 }
  0xa4   : > { %4423 = vmatprep.subr.mxu0 %v6535_v9  ;;  %4402 = vmatpush3.msra.mxu1 %v5607_v13  ;;  %v757_v62 = vand.u32 4294901760, %v756_v58  ;;  %s6468_s12 = scalar_lea.hbm %s6600_s24, %s4180_s8  ;;  %p5243_p9 = pneg %p5242_p3 }
  0xa5   : > { %4424 = vmatpush3.msra.mxu0 %v5616_v15  ;;  %4403 = vmatprep.subr.mxu1 %v6535_v9  ;;  %v743_v56 = vand.u32 4294901760, %v742_v51  ;;  %v750_v60 = vand.u32 4294901760, %v749_v54  ;;  %v764_v63 = vand.u32 4294901760, %v763_v61  ;;  %p5248_p0 = scmp.lt.s32.totalorder %s5246_s29, %s5240_s13 }
  0xa6   : > { %4425 = vmatprep.subr.mxu0 %v6535_v9  ;;  %4404 = vmatpush3.msra.mxu1 %v5610_v14 }
  0xa7   : > { %550 = vxpose.xlu0.b32.end [4/4] (short) (narrow) %v546_v3, 64  ;;  %4426 = vmatpush3.msra.mxu0 %v5619_v16  ;;  %p5249_p7 = por %p5248_p0, %p5247_p13 }
  0xa8   : > { %4441 = vmatprep.subr.mxu0 %v6535_v9  ;;  %4408 = vmatprep.subr.mxu1 %v6535_v9 }
  0xa9   : > { %p5250_p6 = pnand %p5249_p7, %p5243_p9 }
 0x117   : > { %v5636_v17 = vpop.trf.xlu0 }
 0x118   : > { %6580 = vst [vmem:[#allocation21_spill] sm:$0xff] %v5636_v17  ;;  %v611_v23 = vsel %vm610_vm1, %v5636_v17, 0.0 }
 0x11b   : > { %v5638_v18 = vpop.trf.xlu0 }
 0x11c   : > { %6581 = vst [vmem:[#allocation22_spill] sm:$0xff] %v5638_v18  ;;  %v612_v21 = vsel %vm610_vm1, %v5638_v18, 0.0 }
 0x11d   : > { %v613_v25 = vadd.f32 %v612_v21, %v611_v23  ;;  %v579_v23 = vlaneseq }
 0x11f   : > { %v5640_v19 = vpop.trf.xlu0 }
 0x120   : > { %6582 = vst [vmem:[#allocation23_spill] sm:$0xff] %v5640_v19  ;;  %v614_v24 = vsel %vm610_vm1, %v5640_v19, 0.0 }
 0x121   : > { %v615_v27 = vadd.f32 %v614_v24, %v613_v25 }
 0x123   : > { %v5642_v20 = vpop.trf.xlu0 }
 0x124   : > { %6583 = vst [vmem:[#allocation24_spill] sm:$0xff] %v5642_v20  ;;  %v616_v26 = vsel %vm610_vm1, %v5642_v20, 0.0 }
 0x125   : > { %v617_v30 = vadd.f32 %v616_v26, %v615_v27 }
 0x127   : > { %v5646_v22 = vpop.trf.xlu0 }
 0x128   : > { %6584 = vst [vmem:[#allocation25_spill] sm:$0xff] %v5646_v22  ;;  %v618_v29 = vsel %vm610_vm1, %v5646_v22, 0.0 }
 0x129   : > { %v619_v32 = vadd.f32 %v618_v29, %v617_v30  ;;  %v5747_v29 = vshrl.u32 %v579_v23, 7 }
 0x12b   : > { %v5654_v28 = vpop.trf.xlu0  ;;  %vm1746_vm2 = vcmp.lt.s32.totalorder %v5747_v29, 1  ;;  %vm1791_vm3 = vcmp.lt.s32.totalorder %v5747_v29, 7  ;;  %vm588_vm4 = vcmp.ne.s32.totalorder %v5747_v29, 0 }
 0x12c   : > { %6585 = vst [vmem:[#allocation26_spill] sm:$0xff] %v5654_v28  ;;  %v620_v31 = vsel %vm610_vm1, %v5654_v28, 0.0 }
 0x12d   : > { %v621_v35 = vadd.f32 %v620_v31, %v619_v32  ;;  %v5750_v31 = vsub.s32 0, %v5747_v29 }
 0x12f   : > { %v5660_v33 = vpop.trf.xlu0 }
 0x130   : > { %6586 = vst [vmem:[#allocation27_spill] sm:$0xff] %v5660_v33  ;;  %v622_v34 = vsel %vm610_vm1, %v5660_v33, 0.0 }
 0x131   : > { %v623_v36 = vadd.f32 %v622_v34, %v621_v35 }
 0x133   : > { %v5664_v37 = vpop.trf.xlu0 }
 0x134   : > { %6587 = vst [vmem:[#allocation28_spill] sm:$0xff] %v5664_v37  ;;  %v624_v38 = vsel %vm610_vm1, %v5664_v37, 0.0 }
 0x135   : > { %v625_v39 = vadd.f32 %v624_v38, %v623_v36 }
 0x137   : > { %v626_v40 = vrot.slane %v625_v39, 4 }
 0x139   : > { %v627_v41 = vadd.f32 %v626_v40, %v625_v39 }
 0x13b   : > { %v628_v42 = vrot.slane %v627_v41, 2 }
 0x13d   : > { %v629_v43 = vadd.f32 %v628_v42, %v627_v41 }
 0x13f   : > { %v630_v44 = vrot.slane %v629_v43, 1 }
 0x141   : > { %v631_v45 = vadd.f32 %v630_v44, %v629_v43 }
 0x143   : > { %v633_v46 = vsel %vm610_vm1, %v631_v45, 0 }
 0x144   : > { %v5669_v47 = vand.u32 4294901760, %v633_v46 }
 0x146   : > { %v705_v49 = vsub.f32 %v633_v46, %v5669_v47 }
 0x148   : > { %4428 = vmatmul.mubr.f32.vlgmr.msra.gmra.mxu0 %v705_v49  ;;  %v706_v52 = vand.u32 4294901760, %v705_v49 }
 0x149   : > { %4442 = vmatpush3.msra.mxu0 %v5672_v48  ;;  %4449 = vmatprep.mubr.msk.f32.mxu0 %vm5330_vm0, %v6535_v9 }
 0x14a   : > { %4443 = vmatprep.subr.mxu0 %v6535_v9  ;;  %v707_v55 = vsub.f32 %v705_v49, %v706_v52 }
 0x14b   : > { %4444 = vmatpush3.msra.mxu0 %v5676_v50 }
 0x14c   : > { %4445 = vmatprep.subr.mxu0 %v6535_v9  ;;  %v708_v59 = vand.u32 4294901760, %v707_v55 }
 0x14d   : > { %4446 = vmatpush3.msra.mxu0 %v5682_v53 }
 0x14e   : > { %4447 = vmatprep.subr.mxu0 %v6535_v9  ;;  %4406 = vmatmul.mubr.f32.vlgmr.msra.gmra.mxu1 %v708_v59 }
 0x14f   : > { %4409 = vmatpush3.msra.mxu1 %v743_v56  ;;  %4448 = vmatpush3.msra.mxu0 %v5691_v57 }
 0x150   : > { %4410 = vmatprep.subr.mxu1 %v6535_v9  ;;  %4450 = vmatmul.mubr.f32.vlgmr.msra.gmra.mxu0 %v5669_v47 }
 0x151   : > { %4411 = vmatpush3.msra.mxu1 %v750_v60  ;;  %4416 = vmatprep.mubr.msk.f32.mxu1 %vm5330_vm0, %v6535_v9 }
 0x152   : > { %4412 = vmatprep.subr.mxu1 %v6535_v9  ;;  %4463 = vmatprep.subr.mxu0 %v6535_v9 }
 0x153   : > { %4413 = vmatpush3.msra.mxu1 %v757_v62  ;;  %4464 = vmatpush3.msra.mxu0 %v5594_v5 }
 0x154   : > { %4414 = vmatprep.subr.mxu1 %v6535_v9  ;;  %4465 = vmatprep.subr.mxu0 %v6535_v9 }
 0x155   : > { %4415 = vmatpush3.msra.mxu1 %v764_v63  ;;  %4466 = vmatpush3.msra.mxu0 %v5599_v8 }
 0x156   : > { %4417 = vmatmul.mubr.f32.vlgmr.msra.gmra.mxu1 %v5669_v47  ;;  %4430 = vmatprep.subr.mxu1 %v6535_v9 }
 0x157   : > { %4431 = vmatpush3.msra.mxu1 %v5594_v5  ;;  %4438 = vmatprep.mubr.msk.f32.mxu1 %vm5330_vm0, %v6535_v9 }
 0x158   : > { %4432 = vmatprep.subr.mxu1 %v6535_v9  ;;  %4467 = vmatprep.subr.mxu0 %v6535_v9 }
 0x159   : > { %4433 = vmatpush3.msra.mxu1 %v5599_v8  ;;  %4468 = vmatpush3.msra.mxu0 %v5607_v13 }
 0x15a   : > { %4434 = vmatprep.subr.mxu1 %v6535_v9  ;;  %4469 = vmatprep.subr.mxu0 %v6535_v9 }
 0x15b   : > { %4435 = vmatpush3.msra.mxu1 %v5607_v13  ;;  %4470 = vmatpush3.msra.mxu0 %v5610_v14 }
 0x15c   : > { %4436 = vmatprep.subr.mxu1 %v6535_v9  ;;  %4471 = vmatprep.mubr.msk.f32.mxu0 %vm5330_vm0, %v6535_v9 }
 0x15d   : > { %4437 = vmatpush3.msra.mxu1 %v5610_v14  ;;  %4485 = vmatprep.subr.mxu0 %v6535_v9 }
 0x15e   : > { %4439 = vmatmul.mubr.f32.vlgmr.msra.gmra.mxu1 %v706_v52  ;;  %4452 = vmatprep.subr.mxu1 %v6535_v9 }
 0x15f   : > { %4453 = vmatpush3.msra.mxu1 %v5594_v5  ;;  %4460 = vmatprep.mubr.msk.f32.mxu1 %vm5330_vm0, %v6535_v9 }
 0x160   : > { %4454 = vmatprep.subr.mxu1 %v6535_v9 }
 0x161   : > { %4455 = vmatpush3.msra.mxu1 %v5599_v8 }
 0x162   : > { %4456 = vmatprep.subr.mxu1 %v6535_v9 }
 0x163   : > { %4457 = vmatpush3.msra.mxu1 %v5607_v13 }
 0x164   : > { %4458 = vmatprep.subr.mxu1 %v6535_v9 }
 0x165   : > { %4459 = vmatpush3.msra.mxu1 %v5610_v14 }
 0x166   : > { %4461 = vmatmul.mubr.f32.vlgmr.msra.gmra.mxu1 %v5669_v47  ;;  %4474 = vmatprep.subr.mxu1 %v6535_v9 }
 0x167   : > { %4475 = vmatpush3.msra.mxu1 %v743_v56  ;;  %4482 = vmatprep.mubr.msk.f32.mxu1 %vm5330_vm0, %v6535_v9 }
 0x168   : > { %4476 = vmatprep.subr.mxu1 %v6535_v9 }
 0x169   : > { %4477 = vmatpush3.msra.mxu1 %v750_v60 }
 0x16a   : > { %4478 = vmatprep.subr.mxu1 %v6535_v9 }
 0x16b   : > { %4479 = vmatpush3.msra.mxu1 %v757_v62 }
 0x16c   : > { %4480 = vmatprep.subr.mxu1 %v6535_v9 }
 0x16d   : > { %4481 = vmatpush3.msra.mxu1 %v764_v63 }
 0x16e   : > { %4496 = vmatprep.subr.mxu1 %v6535_v9 }
 0x208   : > { %v881_v0 = vpop.f32.mrf.mxu0 }
 0x20a   : > { %v4429_v1 = vpop.f32.mrf.mxu0 }
 0x20e   : > { %v710_v2 = vpop.f32.mrf.mxu1 }
 0x210   : > { %v1041_v3 = vpop.f32.mrf.mxu0  ;;  %v4407_v4 = vpop.f32.mrf.mxu1 }
 0x212   : > { %v4451_v6 = vpop.f32.mrf.mxu0 }
 0x216   : > { %v801_v10 = vpop.f32.mrf.mxu1 }
 0x217   : > { %v802_v21 = vadd.f32 %v801_v10, %v710_v2 }
 0x218   : > { %v4418_v11 = vpop.f32.mrf.mxu1 }
 0x219   : > { %v882_v25 = vadd.f32 %v881_v0, %v802_v21 }
 0x21e   : > { %v958_v24 = vpop.f32.mrf.mxu1 }
 0x21f   : > { %v959_v27 = vadd.f32 %v958_v24, %v882_v25 }
 0x220   : > { %v4440_v26 = vpop.f32.mrf.mxu1 }
 0x221   : > { %v1042_v30 = vadd.f32 %v1041_v3, %v959_v27 }
 0x226   : > { %v1116_v32 = vpop.f32.mrf.mxu1 }
 0x227   : > { %v1117_v34 = vadd.f32 %v1116_v32, %v1042_v30 }
 0x228   : > { %v4462_v35 = vpop.f32.mrf.mxu1 }
 0x229   : > { %v1123_v36 = vrot.slane %v1117_v34, %v5750_v31 }
 0x22b   : > { %v5754_v38 = vsub.f32 %v5636_v17, %v1123_v36  ;;  %v5757_v39 = vsub.f32 %v5638_v18, %v1123_v36  ;;  %v5760_v40 = vsub.f32 %v5640_v19, %v1123_v36  ;;  %v5763_v41 = vsub.f32 %v5642_v20, %v1123_v36 }
 0x22c   : > { %v5766_v42 = vsub.f32 %v5646_v22, %v1123_v36  ;;  %v5775_v46 = vsub.f32 %v5654_v28, %v1123_v36  ;;  %v5782_v54 = vsub.f32 %v5660_v33, %v1123_v36  ;;  %v5788_v59 = vsub.f32 %v5664_v37, %v1123_v36  ;;  %v4132_v22 = vld [vmem:[%s6517_s5] ss:$0 sm:$0xff] }
 0x22d   : > { %v1132_v43 = vmul.f32 %v5754_v38, %v5754_v38  ;;  %v1133_v44 = vmul.f32 %v5757_v39, %v5757_v39  ;;  %v1134_v45 = vmul.f32 %v5760_v40, %v5760_v40  ;;  %v1135_v47 = vmul.f32 %v5763_v41, %v5763_v41 }
 0x22e   : > { %v1136_v55 = vmul.f32 %v5766_v42, %v5766_v42  ;;  %v1137_v60 = vmul.f32 %v5775_v46, %v5775_v46  ;;  %v1138_v63 = vmul.f32 %v5782_v54, %v5782_v54  ;;  %v1139_v2 = vmul.f32 %v5788_v59, %v5788_v59 }
 0x22f   : > { %v1140_v49 = vsel %vm610_vm1, %v1132_v43, 0.0  ;;  %v1141_v51 = vsel %vm610_vm1, %v1133_v44, 0.0  ;;  %v1143_v56 = vsel %vm610_vm1, %v1134_v45, 0.0  ;;  %v1145_v61 = vsel %vm610_vm1, %v1135_v47, 0.0 }
 0x230   : > { %v1142_v52 = vadd.f32 %v1141_v51, %v1140_v49  ;;  %v1147_v0 = vsel %vm610_vm1, %v1136_v55, 0.0  ;;  %v1149_v3 = vsel %vm610_vm1, %v1137_v60, 0.0  ;;  %v1151_v6 = vsel %vm610_vm1, %v1138_v63, 0.0  ;;  %v604_v63 = vld [vmem:[%s6513_s1] sm:$0x1] }
 0x231   : > { %v1153_v11 = vsel %vm610_vm1, %v1139_v2, 0.0 }
 0x232   : > { %v1144_v58 = vadd.f32 %v1143_v56, %v1142_v52 }
 0x234   : > { %v1146_v62 = vadd.f32 %v1145_v61, %v1144_v58 }
 0x236   : > { %v1148_v1 = vadd.f32 %v1147_v0, %v1146_v62 }
 0x238   : > { %v1150_v4 = vadd.f32 %v1149_v3, %v1148_v1  ;;  %v4105_v3 = vld [vmem:[%s6514_s2] ss:$0 sm:$0xff] }
 0x23a   : > { %v1152_v10 = vadd.f32 %v1151_v6, %v1150_v4 }
 0x23c   : > { %v1154_v21 = vadd.f32 %v1153_v11, %v1152_v10 }
 0x23e   : > { %v1155_v23 = vrot.slane %v1154_v21, 4 }
 0x240   : > { %v1156_v24 = vadd.f32 %v1155_v23, %v1154_v21 }
 0x242   : > { %v1157_v25 = vrot.slane %v1156_v24, 2 }
 0x244   : > { %v1158_v26 = vadd.f32 %v1157_v25, %v1156_v24 }
 0x246   : > { %v1159_v27 = vrot.slane %v1158_v26, 1 }
 0x248   : > { %v1160_v30 = vadd.f32 %v1159_v27, %v1158_v26 }
 0x24a   : > { %v1162_v32 = vsel %vm610_vm1, %v1160_v30, 0 }
 0x24b   : > { %v1233_v34 = vand.u32 4294901760, %v1162_v32 }
 0x24d   : > { %v1234_v35 = vsub.f32 %v1162_v32, %v1233_v34  ;;  %4483 = vmatmul.mubr.f32.vlgmr.msra.gmra.mxu1 %v1233_v34 }
 0x24e   : > { %4497 = vmatpush3.msra.mxu1 %v5594_v5  ;;  %4504 = vmatprep.mubr.msk.f32.mxu1 %vm5330_vm0, %v6535_v9 }
 0x24f   : > { %4498 = vmatprep.subr.mxu1 %v6535_v9  ;;  %v1235_v36 = vand.u32 4294901760, %v1234_v35 }
 0x250   : > { %4499 = vmatpush3.msra.mxu1 %v5599_v8 }
 0x251   : > { %4500 = vmatprep.subr.mxu1 %v6535_v9  ;;  %v1236_v43 = vsub.f32 %v1234_v35, %v1235_v36 }
 0x252   : > { %4501 = vmatpush3.msra.mxu1 %v5607_v13 }
 0x253   : > { %4502 = vmatprep.subr.mxu1 %v6535_v9  ;;  %v1237_v44 = vand.u32 4294901760, %v1236_v43 }
 0x254   : > { %4503 = vmatpush3.msra.mxu1 %v5610_v14 }
 0x255   : > { %4505 = vmatmul.mubr.f32.vlgmr.msra.gmra.mxu1 %v1235_v36  ;;  %4518 = vmatprep.subr.mxu1 %v6535_v9 }
 0x256   : > { %4472 = vmatmul.mubr.f32.vlgmr.msra.gmra.mxu0 %v1237_v44  ;;  %4519 = vmatpush3.msra.mxu1 %v5594_v5  ;;  %v4968_v5 = vld [vmem:[#allocation7 + $0x18] sm:$0xff]  }
 0x257   : > { %4486 = vmatpush3.msra.mxu0 %v5597_v7  ;;  %4520 = vmatprep.subr.mxu1 %v6535_v9  ;;  %v4969_v7 = vld [vmem:[#allocation7 + $0x10] sm:$0xff]  }
 0x258   : > { %4487 = vmatprep.subr.mxu0 %v6535_v9  ;;  %4521 = vmatpush3.msra.mxu1 %v5599_v8  ;;  %v4970_v8 = vld [vmem:[#allocation7 + $0x8] sm:$0xff]  }
 0x259   : > { %4488 = vmatpush3.msra.mxu0 %v5605_v12  ;;  %4522 = vmatprep.subr.mxu1 %v6535_v9  ;;  %v5840_v12 = vld [vmem:[#allocation7 + $0x28] sm:$0xff]  }
 0x25a   : > { %4489 = vmatprep.subr.mxu0 %v6535_v9  ;;  %4523 = vmatpush3.msra.mxu1 %v5607_v13  ;;  %v4972_v13 = vld [vmem:[#allocation7] sm:$0xff]  }
 0x25b   : > { %4490 = vmatpush3.msra.mxu0 %v5616_v15  ;;  %4524 = vmatprep.subr.mxu1 %v6535_v9 }
 0x25c   : > { %4491 = vmatprep.subr.mxu0 %v6535_v9  ;;  %4493 = vmatprep.mubr.msk.f32.mxu0 %vm5330_vm0, %v6535_v9 }
 0x25d   : > { %4492 = vmatpush3.msra.mxu0 %v5619_v16  ;;  %4525 = vmatpush3.msra.mxu1 %v5610_v14 }
 0x25e   : > { %4526 = vmatprep.mubr.msk.f32.mxu1 %vm5330_vm0, %v6535_v9  ;;  %4494 = vmatmul.mubr.f32.vlgmr.msra.gmra.mxu0 %v1234_v35 }
 0x25f   : > { %4507 = vmatprep.subr.mxu0 %v6535_v9  ;;  %4527 = vmatmul.mubr.f32.vlgmr.msra.gmra.mxu1 %v1233_v34 }
 0x260   : > { %4508 = vmatpush3.msra.mxu0 %v5672_v48  ;;  %4515 = vmatprep.mubr.msk.f32.mxu0 %vm5330_vm0, %v6535_v9 }
 0x261   : > { %4509 = vmatprep.subr.mxu0 %v6535_v9  ;;  %4541 = vmatprep.subr.bf16.mxu1 %v4970_v8 }
 0x262   : > { %4510 = vmatpush3.msra.mxu0 %v5676_v50  ;;  %4542 = vmatpush3.bf16.msra.mxu1 %v4970_v8 }
 0x263   : > { %4511 = vmatprep.subr.mxu0 %v6535_v9  ;;  %4543 = vmatprep.subr.bf16.mxu1 %v4972_v13 }
 0x264   : > { %4512 = vmatpush3.msra.mxu0 %v5682_v53 }
 0x265   : > { %4513 = vmatprep.subr.mxu0 %v6535_v9 }
 0x266   : > { %4514 = vmatpush3.msra.mxu0 %v5691_v57  ;;  %4544 = vmatpush3.bf16.msra.mxu1 %v4972_v13 }
 0x267   : > { %4516 = vmatmul.mubr.f32.vlgmr.msra.gmra.mxu0 %v1233_v34  ;;  %4529 = vmatprep.subr.bf16.mxu0 %v4968_v5 }
 0x268   : > { %4530 = vmatpush3.bf16.msra.mxu0 %v4968_v5  ;;  %4565 = vmatprep.subr.mxu1 %v6535_v9 }
 0x269   : > { %4531 = vmatprep.subr.bf16.mxu0 %v4969_v7 }
 0x26c   : > { %4532 = vmatpush3.bf16.msra.mxu0 %v4969_v7 }
 0x26d   : > { %4553 = vmatprep.subr.bf16.mxu0 %v5840_v12 }
 0x30d   : > { %v1330_v14 = vpop.f32.mrf.mxu1 }
 0x30f   : > { %v4484_v15 = vpop.f32.mrf.mxu1 }
 0x315   : > { %v1487_v16 = vpop.f32.mrf.mxu1 }
 0x316   : > { %v1239_v48 = vpop.f32.mrf.mxu0 }
 0x317   : > { %v4506_v50 = vpop.f32.mrf.mxu1  ;;  %v1240_v57 = vadd.f32 1e-05, %v1239_v48 }
 0x318   : > { %v4473_v53 = vpop.f32.mrf.mxu0 }
 0x319   : > { %v1331_v49 = vadd.f32 %v1330_v14, %v1240_v57 }
 0x31e   : > { %v1410_v45 = vpop.f32.mrf.mxu0 }
 0x31f   : > { %v1645_v47 = vpop.f32.mrf.mxu1  ;;  %v1411_v55 = vadd.f32 %v1410_v45, %v1331_v49 }
 0x320   : > { %v4495_v51 = vpop.f32.mrf.mxu0 }
 0x321   : > { %v4528_v52 = vpop.f32.mrf.mxu1  ;;  %v1488_v56 = vadd.f32 %v1487_v16, %v1411_v55 }
 0x327   : > { %v1570_v58 = vpop.f32.mrf.mxu0 }
 0x328   : > { %v1571_v60 = vadd.f32 %v1570_v58, %v1488_v56 }
 0x329   : > { %v4517_v61 = vpop.f32.mrf.mxu0 }
 0x32a   : > { %v1646_v62 = vadd.f32 %v1645_v47, %v1571_v60 }
 0x32c   : > { %4988 = vrsqrt.f32 %v1646_v62 }
 0x339   : > { %v4989_v0 = vpop.eup %4988 }
 0x33a   : > { %v1650_v1 = vmul.f32 %v4989_v0, %v604_v63 }
 0x33c   : > { %v1654_v2 = vrot.slane %v1650_v1, %v5750_v31 }
 0x33e   : > { %v1655_v4 = vmul.f32 %v1654_v2, %v5754_v38  ;;  %v1656_v6 = vmul.f32 %v1654_v2, %v5757_v39  ;;  %v1657_v10 = vmul.f32 %v1654_v2, %v5760_v40  ;;  %v1658_v11 = vmul.f32 %v1654_v2, %v5763_v41 }
 0x33f   : > { %v1659_v21 = vmul.f32 %v1654_v2, %v5766_v42  ;;  %v1660_v23 = vmul.f32 %v1654_v2, %v5775_v46  ;;  %v1662_v24 = vmul.f32 %v1654_v2, %v5788_v59  ;;  %v1661_v25 = vmul.f32 %v1654_v2, %v5782_v54 }
 0x340   : > { %v1669_v26 = vadd.f32 %v4105_v3, %v1655_v4  ;;  %v1670_v27 = vadd.f32 %v4105_v3, %v1656_v6  ;;  %v1671_v30 = vadd.f32 %v4105_v3, %v1657_v10  ;;  %v1672_v32 = vadd.f32 %v4105_v3, %v1658_v11 }
 0x341   : > { %v1673_v34 = vadd.f32 %v4105_v3, %v1659_v21  ;;  %v1674_v38 = vadd.f32 %v4105_v3, %v1660_v23  ;;  %v1676_v40 = vadd.f32 %v4105_v3, %v1662_v24  ;;  %v5859_v41 = vadd.f32 %v4105_v3, %v1661_v25  ;;  %v4973_v23 = vld [vmem:[#allocation7 + $0x20] sm:$0xff]  }
 0x342   : > { %v4106_v35 = vmul.f32 -1.442695, %v1669_v26  ;;  %v4107_v39 = vmul.f32 -1.442695, %v1670_v27  ;;  %v4108_v36 = vmul.f32 -1.442695, %v1671_v30 }
 0x343   : > { %v4109_v43 = vmul.f32 -1.442695, %v1672_v32  ;;  %v4110_v42 = vmul.f32 -1.442695, %v1673_v34  ;;  %v4111_v46 = vmul.f32 -1.442695, %v1674_v38 }
 0x344   : > { %4990 = vpow2.f32 %v4106_v35  ;;  %v4113_v59 = vmul.f32 -1.442695, %v1676_v40  ;;  %v4112_v54 = vmul.f32 -1.442695, %v5859_v41 }
 0x345   : > { %4992 = vpow2.f32 %v4107_v39 }
 0x346   : > { %4994 = vpow2.f32 %v4108_v36 }
 0x347   : > { %4996 = vpow2.f32 %v4109_v43 }
 0x348   : > { %4998 = vpow2.f32 %v4110_v42 }
 0x349   : > { %5000 = vpow2.f32 %v4111_v46 }
 0x34a   : > { %5002 = vpow2.f32 %v4113_v59 }
 0x34b   : > { %5004 = vpow2.f32 %v4112_v54 }
 0x351   : > { %v4991_v44 = vpop.eup %4990 }
 0x352   : > { %v4993_v5 = vpop.eup %4992  ;;  %v1701_v7 = vadd.f32 1.0, %v4991_v44 }
 0x353   : > { %v4995_v8 = vpop.eup %4994  ;;  %v1702_v13 = vadd.f32 1.0, %v4993_v5 }
 0x354   : > { %v4997_v14 = vpop.eup %4996  ;;  %5006 = vrcp.f32 %v1701_v7  ;;  %v1703_v15 = vadd.f32 1.0, %v4995_v8 }
 0x355   : > { %v4999_v16 = vpop.eup %4998  ;;  %5008 = vrcp.f32 %v1702_v13  ;;  %v1704_v48 = vadd.f32 1.0, %v4997_v14 }
 0x356   : > { %v5001_v50 = vpop.eup %5000  ;;  %5010 = vrcp.f32 %v1703_v15  ;;  %v1705_v53 = vadd.f32 1.0, %v4999_v16 }
 0x357   : > { %v5003_v57 = vpop.eup %5002  ;;  %5012 = vrcp.f32 %v1704_v48  ;;  %v1706_v45 = vadd.f32 1.0, %v5001_v50 }
 0x358   : > { %v5005_v47 = vpop.eup %5004  ;;  %5014 = vrcp.f32 %v1705_v53  ;;  %v1708_v49 = vadd.f32 1.0, %v5003_v57 }
 0x359   : > { %5016 = vrcp.f32 %v1706_v45  ;;  %v1707_v51 = vadd.f32 1.0, %v5005_v47 }
 0x35a   : > { %5018 = vrcp.f32 %v1708_v49 }
 0x35b   : > { %5020 = vrcp.f32 %v1707_v51 }
 0x361   : > { %v5007_v52 = vpop.eup %5006 }
 0x362   : > { %v5009_v55 = vpop.eup %5008  ;;  %v5862_v56 = vmul.f32 %v5007_v52, %v1669_v26 }
 0x363   : > { %v5011_v58 = vpop.eup %5010  ;;  %v1726_v60 = vmul.f32 %v5009_v55, %v1670_v27 }
 0x364   : > { %v5013_v61 = vpop.eup %5012  ;;  %v1727_v62 = vmul.f32 %v5011_v58, %v1671_v30  ;;  %v1738_v4 = vrot.slane %v5862_v56, 7  ;;  %v1783_v36 = vrot.slane %v5862_v56, 1 }
 0x365   : > { %v5015_v63 = vpop.eup %5014  ;;  %v1734_v0 = vpack.c.bf16 %v1726_v60, %v5862_v56  ;;  %v1728_v1 = vmul.f32 %v5013_v61, %v1672_v32  ;;  %v1739_v21 = vrot.slane %v1726_v60, 7  ;;  %v1784_v24 = vrot.slane %v1726_v60, 1 }
 0x366   : > { %v5017_v2 = vpop.eup %5016  ;;  %v1729_v3 = vmul.f32 %v5015_v63, %v1673_v34  ;;  %v1740_v27 = vrot.slane %v1727_v62, 7  ;;  %v1785_v32 = vrot.slane %v1727_v62, 1  ;;  %v5912_v56 = vadd.s32 56, %v5747_v29 }
 0x367   : > { %v5019_v6 = vpop.eup %5018  ;;  %4533 = vmatprep.mubr.msk.bf16.mxu0 %vm610_vm1, %v1734_v0  ;;  %v1735_v10 = vpack.c.bf16 %v1728_v1, %v1727_v62  ;;  %v1730_v11 = vmul.f32 %v5017_v2, %v1674_v38  ;;  %v1741_v30 = vrot.slane %v1728_v1, 7  ;;  %v1798_v5 = vsel %vm1791_vm3, %v1783_v36, %v1784_v24 }
 0x368   : > { %v5021_v25 = vpop.eup %5020  ;;  %v1732_v26 = vmul.f32 %v5019_v6, %v1676_v40  ;;  %v1742_v39 = vrot.slane %v1729_v3, 7  ;;  %v1753_v40 = vsel %vm1746_vm2, %v1738_v4, %v1739_v21  ;;  %v1797_v59 = vsel %vm1791_vm3, %v1784_v24, %v1785_v32  ;;  %6588 = vst [vmem:[#allocation29_spill] sm:$0xff] %v5912_v56  ;;  %v2139_v6 = vld [vmem:[#allocation10 + $0x30] sm:$0xff] }
 0x369   : > { %4534 = vmatmul.mubr.msk.bf16.vlgmr.msra.gmra.mxu0 %vm610_vm1, %v1735_v10  ;;  %v1736_v35 = vpack.c.bf16 %v1730_v11, %v1729_v3  ;;  %v1743_v34 = vrot.slane %v1730_v11, 7  ;;  %v1731_v43 = vmul.f32 %v5021_v25, %v5859_v41  ;;  %v1751_v46 = vsel %vm1746_vm2, %v1740_v27, %v1741_v30 }
 0x36a   : > { %4554 = vmatpush3.bf16.msra.mxu0 %v5840_v12  ;;  %v1745_v38 = vrot.slane %v1732_v26, 7  ;;  %v1752_v12 = vsel %vm1746_vm2, %v1739_v21, %v1740_v27  ;;  %v1750_v41 = vsel %vm1746_vm2, %v1741_v30, %v1742_v39  ;;  %v1786_v8 = vrot.slane %v1728_v1, 1  ;;  %v2138_v21 = vld [vmem:[#allocation10 + $0x28] sm:$0xff] }
 0x36b   : > { %4537 = vmatprep.mubr.msk.bf16.mxu0 %vm610_vm1, %v1736_v35  ;;  %4555 = vmatprep.subr.bf16.mxu0 %v4973_v23  ;;  %v1749_v44 = vsel %vm1746_vm2, %v1742_v39, %v1743_v34  ;;  %v1780_v13 = vpack.c.bf16 %v1751_v46, %v1752_v12  ;;  %v1737_v14 = vpack.c.bf16 %v1732_v26, %v1731_v43  ;;  %v1787_v15 = vrot.slane %v1729_v3, 1  ;;  %v2140_v3 = vld [vmem:[#allocation10 + $0x38] sm:$0xff] }
 0x36c   : > { %v1754_v42 = vsel %vm1746_vm2, %v1745_v38, %v1738_v4  ;;  %v1781_v16 = vpack.c.bf16 %v1749_v44, %v1750_v41  ;;  %v1824_v48 = vpack.c.bf16 %v1797_v59, %v1798_v5  ;;  %v1744_v50 = vrot.slane %v1731_v43, 7  ;;  %v2136_v39 = vld [vmem:[#allocation10 + $0x18] sm:$0xff]  ;;  %v2134_v44 = vld [vmem:[#allocation10 + $0x8] sm:$0xff]  ;;  %v2133_v41 = vld [vmem:[#allocation10] sm:$0xff] }
 0x36d   : > { %v1771_v54 = vsel %vm588_vm4, %v1754_v42, 0.0  ;;  %v1788_v53 = vrot.slane %v1730_v11, 1  ;;  %v1789_v57 = vrot.slane %v1731_v43, 1  ;;  %v1796_v45 = vsel %vm1791_vm3, %v1785_v32, %v1786_v8  ;;  %v2135_v42 = vld [vmem:[#allocation10 + $0x10] sm:$0xff] }
 0x36e   : > { %v1779_v7 = vpack.c.bf16 %v1753_v40, %v1771_v54  ;;  %4556 = vmatpush3.bf16.msra.mxu0 %v4973_v23  ;;  %v1747_v47 = vsel %vm1746_vm2, %v1744_v50, %v1745_v38  ;;  %v1748_v49 = vsel %vm1746_vm2, %v1743_v34, %v1744_v50  ;;  %v1795_v51 = vsel %vm1791_vm3, %v1786_v8, %v1787_v15 }
 0x36f   : > { %4584 = vmatprep.subr.mxu0 %v6535_v9  ;;  %v1793_v52 = vsel %vm1791_vm3, %v1788_v53, %v1789_v57  ;;  %v1794_v55 = vsel %vm1791_vm3, %v1787_v15, %v1788_v53  ;;  %v1790_v58 = vrot.slane %v1732_v26, 1  ;;  %v1782_v60 = vpack.c.bf16 %v1747_v47, %v1748_v49  ;;  %v2137_v26 = vld [vmem:[#allocation10 + $0x20] sm:$0xff] }
 0x370   : > { %4545 = vmatprep.mubr.msk.bf16.mxu1 %vm610_vm1, %v1779_v7  ;;  %v1825_v61 = vpack.c.bf16 %v1795_v51, %v1796_v45  ;;  %v1826_v62 = vpack.c.bf16 %v1793_v52, %v1794_v55  ;;  %vm603_vm5 = vcmp.ne.s32.totalorder %v5912_v56, 63  ;;  %v5929_v4 = vand.u32 4294901760, %v2140_v3 }
 0x371   : > { %4546 = vmatmul.mubr.msk.bf16.vlgmr.msra.gmra.mxu1 %vm610_vm1, %v1780_v13  ;;  %4538 = vmatmul.mubr.msk.bf16.gmra.mxu0 %vm610_vm1, %v1737_v14  ;;  %v1799_v63 = vsel %vm1791_vm3, %v1790_v58, %v1783_v36  ;;  %v1792_v0 = vsel %vm1791_vm3, %v1789_v57, %v1790_v58  ;;  %v5934_v11 = vand.u32 4294901760, %v2139_v6  ;;  %v5944_v25 = vand.u32 4294901760, %v2138_v21 }
 0x372   : > { %4549 = vmatprep.mubr.msk.bf16.mxu1 %vm610_vm1, %v1781_v16  ;;  %4557 = vmatprep.mubr.msk.bf16.mxu0 %vm610_vm1, %v1824_v48  ;;  %v1823_v1 = vsel %vm603_vm5, %v1799_v63, 0.0  ;;  %v5932_v10 = vsub.f32 %v2140_v3, %v5929_v4  ;;  %v5956_v35 = vand.u32 4294901760, %v2137_v26  ;;  %v5971_v43 = vand.u32 4294901760, %v2136_v39 }
 0x373   : > { %v1827_v2 = vpack.c.bf16 %v1823_v1, %v1792_v0  ;;  %4566 = vmatpush3.msra.mxu1 %v5929_v4  ;;  %v5942_v24 = vsub.f32 %v2139_v6, %v5934_v11  ;;  %v5954_v32 = vsub.f32 %v2138_v21, %v5944_v25  ;;  %v5982_v54 = vand.u32 4294901760, %v2135_v42 }
 0x374   : > { %4567 = vmatprep.subr.mxu1 %v6535_v9  ;;  %v5939_v23 = vand.u32 4294901760, %v5932_v10  ;;  %v5968_v40 = vsub.f32 %v2137_v26, %v5956_v35  ;;  %v5986_v5 = vsub.f32 %v2136_v39, %v5971_v43  ;;  %v5988_v7 = vand.u32 4294901760, %v2134_v44 }
 0x375   : > { %4568 = vmatpush3.msra.mxu1 %v5934_v11  ;;  %v5951_v30 = vand.u32 4294901760, %v5942_v24  ;;  %v5965_v38 = vand.u32 4294901760, %v5954_v32  ;;  %v5990_v8 = vand.u32 4294901760, %v2133_v41  ;;  %v5999_v15 = vsub.f32 %v2135_v42, %v5982_v54 }
 0x376   : > { %4569 = vmatprep.subr.mxu1 %v6535_v9  ;;  %v2269_v27 = vsub.f32 %v5932_v10, %v5939_v23  ;;  %v5980_v59 = vand.u32 4294901760, %v5968_v40  ;;  %v6004_v16 = vand.u32 4294901760, %v5986_v5  ;;  %v6007_v48 = vsub.f32 %v2134_v44, %v5988_v7 }
 0x377   : > { %4570 = vmatpush3.msra.mxu1 %v5944_v25  ;;  %v2276_v36 = vsub.f32 %v5942_v24, %v5951_v30  ;;  %v2283_v12 = vsub.f32 %v5954_v32, %v5965_v38  ;;  %v6010_v50 = vsub.f32 %v2133_v41, %v5990_v8  ;;  %v6017_v57 = vand.u32 4294901760, %v5999_v15 }
 0x378   : > { %4571 = vmatprep.subr.mxu1 %v6535_v9  ;;  %v5960_v34 = vand.u32 4294901760, %v2269_v27  ;;  %v2290_v14 = vsub.f32 %v5968_v40, %v5980_v59  ;;  %v2297_v45 = vsub.f32 %v5986_v5, %v6004_v16  ;;  %v6024_v47 = vand.u32 4294901760, %v6007_v48 }
 0x379   : > { %4550 = vmatmul.mubr.msk.bf16.gmra.mxu1 %vm610_vm1, %v1782_v60  ;;  %4558 = vmatmul.mubr.msk.bf16.vlgmr.msra.gmra.mxu0 %vm610_vm1, %v1825_v61  ;;  %v5975_v46 = vand.u32 4294901760, %v2276_v36  ;;  %v5994_v13 = vand.u32 4294901760, %v2283_v12  ;;  %v6027_v49 = vand.u32 4294901760, %v6010_v50  ;;  %v2304_v51 = vsub.f32 %v5999_v15, %v6017_v57 }
 0x37a   : > { %4561 = vmatprep.mubr.msk.bf16.mxu0 %vm610_vm1, %v1826_v62  ;;  %4581 = vmatprep.mubr.msk.f32.mxu1 %vm5330_vm0, %v6535_v9  ;;  %v6014_v53 = vand.u32 4294901760, %v2290_v14  ;;  %v6035_v52 = vand.u32 4294901760, %v2297_v45  ;;  %v2311_v55 = vsub.f32 %v6007_v48, %v6024_v47 }
 0x37b   : > { %4572 = vmatpush3.msra.mxu1 %v5956_v35  ;;  %4585 = vmatpush3.msra.mxu0 %v5960_v34  ;;  %v2318_v58 = vsub.f32 %v6010_v50, %v6027_v49  ;;  %v6042_v60 = vand.u32 4294901760, %v2304_v51 }
 0x37c   : > { %4573 = vmatprep.subr.mxu1 %v6535_v9  ;;  %4586 = vmatprep.subr.mxu0 %v6535_v9  ;;  %v6046_v61 = vand.u32 4294901760, %v2311_v55 }
 0x37d   : > { %4574 = vmatpush3.msra.mxu1 %v5971_v43  ;;  %4587 = vmatpush3.msra.mxu0 %v5975_v46  ;;  %v6050_v62 = vand.u32 4294901760, %v2318_v58 }
 0x37e   : > { %4575 = vmatprep.subr.mxu1 %v6535_v9  ;;  %4588 = vmatprep.subr.mxu0 %v6535_v9 }
 0x37f   : > { %4576 = vmatpush3.msra.mxu1 %v5982_v54  ;;  %4589 = vmatpush3.msra.mxu0 %v5994_v13 }
 0x380   : > { %4577 = vmatprep.subr.mxu1 %v6535_v9  ;;  %4590 = vmatprep.subr.mxu0 %v6535_v9 }
 0x381   : > { %4562 = vmatmul.mubr.msk.bf16.gmra.mxu0 %vm610_vm1, %v1827_v2  ;;  %4578 = vmatpush3.msra.mxu1 %v5988_v7 }
 0x382   : > { %4600 = vmatprep.mubr.msk.f32.mxu0 %vm5330_vm0, %v6535_v9  ;;  %4591 = vmatpush3.msra.mxu0 %v6014_v53 }
 0x383   : > { %4579 = vmatprep.subr.mxu1 %v6535_v9  ;;  %4592 = vmatprep.subr.mxu0 %v6535_v9 }
 0x384   : > { %4580 = vmatpush3.msra.mxu1 %v5990_v8  ;;  %4593 = vmatpush3.msra.mxu0 %v6035_v52 }
 0x385   : > { %4603 = vmatprep.subr.mxu1 %v6535_v9  ;;  %4594 = vmatprep.subr.mxu0 %v6535_v9 }
 0x386   : > { %4595 = vmatpush3.msra.mxu0 %v6042_v60 }
 0x387   : > { %4596 = vmatprep.subr.mxu0 %v6535_v9 }
 0x388   : > { %4597 = vmatpush3.msra.mxu0 %v6046_v61 }
 0x389   : > { %4598 = vmatprep.subr.mxu0 %v6535_v9 }
 0x38a   : > { %4599 = vmatpush3.msra.mxu0 %v6050_v62 }
 0x38b   : > { %4622 = vmatprep.subr.mxu0 %v6535_v9 }
 0x429   : > { %v4535_v63 = vpop.f32.mrf.mxu0 }
 0x42b   : > { %v1895_v0 = vpop.f32.mrf.mxu0 }
 0x42d   : > { %v4536_v1 = vpop.f32.mrf.mxu0 }
 0x42f   : > { %v1898_v2 = vpop.f32.mrf.mxu0 }
 0x431   : > { %v4547_v3 = vpop.f32.mrf.mxu1  ;;  %v4539_v6 = vpop.f32.mrf.mxu0 }
 0x432   : > { %v1993_v51 = vadd.f32 %v4547_v3, %v4535_v63 }
 0x433   : > { %v1984_v21 = vpop.f32.mrf.mxu1  ;;  %v1911_v26 = vpop.f32.mrf.mxu0 }
 0x434   : > { %v1985_v41 = vadd.f32 %v1984_v21, %v1895_v0 }
 0x435   : > { %v4548_v27 = vpop.f32.mrf.mxu1  ;;  %v4540_v39 = vpop.f32.mrf.mxu0 }
 0x436   : > { %v1996_v9 = vadd.f32 %v4548_v27, %v4536_v1 }
 0x437   : > { %v1987_v36 = vpop.f32.mrf.mxu1  ;;  %v1914_v42 = vpop.f32.mrf.mxu0 }
 0x438   : > { %v1988_v37 = vadd.f32 %v1987_v36, %v1898_v2 }
 0x439   : > { %v4551_v12 = vpop.f32.mrf.mxu1  ;;  %v4559_v44 = vpop.f32.mrf.mxu0 }
 0x43a   : > { %v2111_v33 = vadd.f32 %v4559_v44, %v1993_v51  ;;  %v2009_v3 = vadd.f32 %v4551_v12, %v4539_v6 }
 0x43b   : > { %v2000_v14 = vpop.f32.mrf.mxu1  ;;  %v2078_v45 = vpop.f32.mrf.mxu0 }
 0x43c   : > { %v2109_v55 = vadd.f32 %v2078_v45, %v1985_v41  ;;  %v2001_v0 = vadd.f32 %v2000_v14, %v1911_v26  ;;  %v6062_v21 = vadd.f32 %v4132_v22, %v2111_v33 }
 0x43d   : > { %v4560_v58 = vpop.f32.mrf.mxu0  ;;  %v4552_v28 = vpop.f32.mrf.mxu1 }
 0x43e   : > { %v6060_v19 = vadd.f32 %v4132_v22, %v2109_v55  ;;  %v2112_v56 = vadd.f32 %v4560_v58, %v1996_v9 }
 0x43f   : > { %v2081_v20 = vpop.f32.mrf.mxu0  ;;  %v2003_v1 = vpop.f32.mrf.mxu1 }
 0x440   : > { %v2110_v18 = vadd.f32 %v2081_v20, %v1988_v37  ;;  %v2142_v27 = vsel %vm2141_vm6, %v6060_v19, 0.0  ;;  %v6068_v36 = vadd.f32 %v4132_v22, %v2112_v56  ;;  %v2012_v20 = vadd.f32 %v4552_v28, %v4540_v39 }
 0x441   : > { %v4563_v17 = vpop.f32.mrf.mxu0  ;;  %v2004_v33 = vadd.f32 %v2003_v1, %v1914_v42 }
 0x442   : > { %v6064_v63 = vadd.f32 %v4132_v22, %v2110_v18  ;;  %v2145_v18 = vsel %vm2141_vm6, %v6062_v21, 0.0  ;;  %v2115_v6 = vadd.f32 %v4563_v17, %v2009_v3  ;;  %v2147_v56 = vsel %vm2141_vm6, %v6068_v36, 0.0 }
 0x443   : > { %v2094_v2 = vpop.f32.mrf.mxu0 }
 0x444   : > { %v2143_v44 = vsel %vm2141_vm6, %v6064_v63, 0.0  ;;  %v2113_v9 = vadd.f32 %v2094_v2, %v2001_v0  ;;  %v6078_v58 = vadd.f32 %v4132_v22, %v2115_v6 }
 0x445   : > { %v2144_v37 = vadd.f32 %v2143_v44, %v2142_v27  ;;  %v4564_v26 = vpop.f32.mrf.mxu0 }
 0x446   : > { %v6074_v12 = vadd.f32 %v4132_v22, %v2113_v9  ;;  %v2116_v45 = vadd.f32 %v4564_v26, %v2012_v20  ;;  %v2153_v1 = vsel %vm2141_vm6, %v6078_v58, 0.0 }
 0x447   : > { %v2146_v41 = vadd.f32 %v2145_v18, %v2144_v37  ;;  %v2097_v14 = vpop.f32.mrf.mxu0 }
 0x448   : > { %v2114_v51 = vadd.f32 %v2097_v14, %v2004_v33  ;;  %v2149_v28 = vsel %vm2141_vm6, %v6074_v12, 0.0  ;;  %v6084_v42 = vadd.f32 %v4132_v22, %v2116_v45  ;;  %v6589_v14 = vmov 0.0  }
 0x449   : > { %v2148_v55 = vadd.f32 %v2147_v56, %v2146_v41 }
 0x44a   : > { %v6082_v39 = vadd.f32 %v4132_v22, %v2114_v51  ;;  %v2155_v27 = vsel %vm2141_vm6, %v6084_v42, 0.0 }
 0x44b   : > { %v2150_v0 = vadd.f32 %v2149_v28, %v2148_v55 }
 0x44c   : > { %v2151_v17 = vsel %vm2141_vm6, %v6082_v39, 0.0 }
 0x44d   : > { %v2152_v3 = vadd.f32 %v2151_v17, %v2150_v0 }
 0x44f   : > { %v2154_v2 = vadd.f32 %v2153_v1, %v2152_v3 }
 0x451   : > { %v2156_v44 = vadd.f32 %v2155_v27, %v2154_v2 }
 0x453   : > { %v2157_v9 = vrot.slane %v2156_v44, 4 }
 0x455   : > { %v2158_v20 = vadd.f32 %v2157_v9, %v2156_v44 }
 0x457   : > { %v2159_v37 = vrot.slane %v2158_v20, 2 }
 0x459   : > { %v2160_v26 = vadd.f32 %v2159_v37, %v2158_v20 }
 0x45b   : > { %v2161_v18 = vrot.slane %v2160_v26, 1 }
 0x45d   : > { %v2162_v33 = vadd.f32 %v2161_v18, %v2160_v26 }
 0x45f   : > { %v2164_v22 = vsel %vm2141_vm6, %v2162_v33, 0 }
 0x460   : > { %v6093_v6 = vand.u32 4294901760, %v2164_v22 }
 0x462   : > { %v2240_v41 = vsub.f32 %v2164_v22, %v6093_v6  ;;  %4601 = vmatmul.mubr.f32.vlgmr.msra.gmra.mxu0 %v6093_v6 }
 0x463   : > { %4623 = vmatpush3.msra.mxu0 %v5929_v4  ;;  %4638 = vmatprep.mubr.msk.f32.mxu0 %vm5330_vm0, %v6589_v14 }
 0x464   : > { %4624 = vmatprep.subr.mxu0 %v6589_v14  ;;  %v2241_v56 = vand.u32 4294901760, %v2240_v41 }
 0x465   : > { %4625 = vmatpush3.msra.mxu0 %v5934_v11 }
 0x466   : > { %4626 = vmatprep.subr.mxu0 %v6589_v14  ;;  %v2242_v45 = vsub.f32 %v2240_v41, %v2241_v56 }
 0x467   : > { %4627 = vmatpush3.msra.mxu0 %v5944_v25 }
 0x468   : > { %4628 = vmatprep.subr.mxu0 %v6589_v14  ;;  %v2243_v51 = vand.u32 4294901760, %v2242_v45 }
 0x469   : > { %4629 = vmatpush3.msra.mxu0 %v5956_v35 }
 0x46a   : > { %4630 = vmatprep.subr.mxu0 %v6589_v14  ;;  %4582 = vmatmul.mubr.f32.vlgmr.msra.gmra.mxu1 %v2243_v51 }
 0x46b   : > { %4604 = vmatpush3.msra.mxu1 %v5932_v10  ;;  %4631 = vmatpush3.msra.mxu0 %v5971_v43 }
 0x46c   : > { %4605 = vmatprep.subr.mxu1 %v6589_v14  ;;  %4632 = vmatprep.subr.mxu0 %v6589_v14 }
 0x46d   : > { %4606 = vmatpush3.msra.mxu1 %v5942_v24  ;;  %4633 = vmatpush3.msra.mxu0 %v5982_v54 }
 0x46e   : > { %4607 = vmatprep.subr.mxu1 %v6589_v14  ;;  %4634 = vmatprep.subr.mxu0 %v6589_v14 }
 0x46f   : > { %4608 = vmatpush3.msra.mxu1 %v5954_v32  ;;  %4635 = vmatpush3.msra.mxu0 %v5988_v7 }
 0x470   : > { %4609 = vmatprep.subr.mxu1 %v6589_v14  ;;  %4636 = vmatprep.subr.mxu0 %v6589_v14 }
 0x471   : > { %4610 = vmatpush3.msra.mxu1 %v5968_v40  ;;  %4637 = vmatpush3.msra.mxu0 %v5990_v8 }
 0x472   : > { %4611 = vmatprep.subr.mxu1 %v6589_v14  ;;  %4639 = vmatmul.mubr.f32.vlgmr.msra.gmra.mxu0 %v2241_v56 }
 0x473   : > { %4660 = vmatprep.subr.mxu0 %v6589_v14  ;;  %4612 = vmatpush3.msra.mxu1 %v5986_v5 }
 0x474   : > { %4661 = vmatpush3.msra.mxu0 %v5929_v4  ;;  %4613 = vmatprep.subr.mxu1 %v6589_v14 }
 0x475   : > { %4662 = vmatprep.subr.mxu0 %v6589_v14  ;;  %4614 = vmatpush3.msra.mxu1 %v5999_v15 }
 0x476   : > { %4663 = vmatpush3.msra.mxu0 %v5934_v11  ;;  %4615 = vmatprep.subr.mxu1 %v6589_v14 }
 0x477   : > { %4664 = vmatprep.subr.mxu0 %v6589_v14  ;;  %4616 = vmatpush3.msra.mxu1 %v6007_v48 }
 0x478   : > { %4665 = vmatpush3.msra.mxu0 %v5944_v25  ;;  %4617 = vmatprep.subr.mxu1 %v6589_v14 }
 0x479   : > { %4666 = vmatprep.subr.mxu0 %v6589_v14  ;;  %4618 = vmatpush3.msra.mxu1 %v6010_v50 }
 0x47a   : > { %4619 = vmatprep.mubr.msk.f32.mxu1 %vm5330_vm0, %v6589_v14  ;;  %4667 = vmatpush3.msra.mxu0 %v5956_v35 }
 0x47b   : > { %4620 = vmatmul.mubr.f32.vlgmr.msra.gmra.mxu1 %v2240_v41  ;;  %4641 = vmatprep.subr.mxu1 %v6589_v14 }
 0x47c   : > { %4668 = vmatprep.subr.mxu0 %v6589_v14  ;;  %4642 = vmatpush3.msra.mxu1 %v5939_v23 }
 0x47d   : > { %4669 = vmatpush3.msra.mxu0 %v5971_v43  ;;  %4643 = vmatprep.subr.mxu1 %v6589_v14 }
 0x47e   : > { %4670 = vmatprep.subr.mxu0 %v6589_v14  ;;  %4644 = vmatpush3.msra.mxu1 %v5951_v30 }
 0x47f   : > { %4671 = vmatpush3.msra.mxu0 %v5982_v54  ;;  %4645 = vmatprep.subr.mxu1 %v6589_v14 }
 0x480   : > { %4672 = vmatprep.subr.mxu0 %v6589_v14  ;;  %4646 = vmatpush3.msra.mxu1 %v5965_v38 }
 0x481   : > { %4673 = vmatpush3.msra.mxu0 %v5988_v7  ;;  %4647 = vmatprep.subr.mxu1 %v6589_v14 }
 0x482   : > { %4674 = vmatprep.subr.mxu0 %v6589_v14  ;;  %4648 = vmatpush3.msra.mxu1 %v5980_v59 }
 0x483   : > { %4675 = vmatpush3.msra.mxu0 %v5990_v8  ;;  %4676 = vmatprep.mubr.msk.f32.mxu0 %vm5330_vm0, %v6589_v14 }
 0x484   : > { %4649 = vmatprep.subr.mxu1 %v6589_v14  ;;  %4677 = vmatmul.mubr.f32.vlgmr.msra.gmra.mxu0 %v6093_v6 }
 0x485   : > { %4650 = vmatpush3.msra.mxu1 %v6004_v16  ;;  %4657 = vmatprep.mubr.msk.f32.mxu1 %vm5330_vm0, %v6589_v14 }
 0x486   : > { %4651 = vmatprep.subr.mxu1 %v6589_v14  ;;  %4698 = vmatprep.subr.mxu0 %v6589_v14 }
 0x487   : > { %4652 = vmatpush3.msra.mxu1 %v6017_v57  ;;  %4699 = vmatpush3.msra.mxu0 %v5960_v34 }
 0x488   : > { %4653 = vmatprep.subr.mxu1 %v6589_v14  ;;  %4700 = vmatprep.subr.mxu0 %v6589_v14 }
 0x489   : > { %4654 = vmatpush3.msra.mxu1 %v6024_v47  ;;  %4701 = vmatpush3.msra.mxu0 %v5975_v46 }
 0x48a   : > { %4655 = vmatprep.subr.mxu1 %v6589_v14  ;;  %4702 = vmatprep.subr.mxu0 %v6589_v14 }
 0x48b   : > { %4656 = vmatpush3.msra.mxu1 %v6027_v49  ;;  %4703 = vmatpush3.msra.mxu0 %v5994_v13 }
 0x48c   : > { %4658 = vmatmul.mubr.f32.vlgmr.msra.gmra.mxu1 %v6093_v6  ;;  %4704 = vmatprep.subr.mxu0 %v6589_v14 }
 0x48d   : > { %4705 = vmatpush3.msra.mxu0 %v6014_v53  ;;  %4679 = vmatprep.subr.mxu1 %v6589_v14 }
 0x48e   : > { %4706 = vmatprep.subr.mxu0 %v6589_v14  ;;  %4680 = vmatpush3.msra.mxu1 %v5929_v4 }
 0x48f   : > { %4707 = vmatpush3.msra.mxu0 %v6035_v52  ;;  %4681 = vmatprep.subr.mxu1 %v6589_v14 }
 0x490   : > { %4708 = vmatprep.subr.mxu0 %v6589_v14  ;;  %4682 = vmatpush3.msra.mxu1 %v5934_v11 }
 0x491   : > { %4709 = vmatpush3.msra.mxu0 %v6042_v60  ;;  %4683 = vmatprep.subr.mxu1 %v6589_v14 }
 0x492   : > { %4710 = vmatprep.subr.mxu0 %v6589_v14  ;;  %4684 = vmatpush3.msra.mxu1 %v5944_v25 }
 0x493   : > { %4711 = vmatpush3.msra.mxu0 %v6046_v61  ;;  %4685 = vmatprep.subr.mxu1 %v6589_v14 }
 0x494   : > { %4712 = vmatprep.subr.mxu0 %v6589_v14  ;;  %4686 = vmatpush3.msra.mxu1 %v5956_v35 }
 0x495   : > { %4713 = vmatpush3.msra.mxu0 %v6050_v62  ;;  %4687 = vmatprep.subr.mxu1 %v6589_v14 }
 0x496   : > { %4714 = vmatprep.mubr.msk.f32.mxu0 %vm5330_vm0, %v6589_v14  ;;  %4736 = vmatprep.subr.mxu0 %v6589_v14 }
 0x497   : > { %4688 = vmatpush3.msra.mxu1 %v5971_v43  ;;  %4695 = vmatprep.mubr.msk.f32.mxu1 %vm5330_vm0, %v6589_v14 }
 0x498   : > { %4689 = vmatprep.subr.mxu1 %v6589_v14 }
 0x499   : > { %4690 = vmatpush3.msra.mxu1 %v5982_v54 }
 0x49a   : > { %4691 = vmatprep.subr.mxu1 %v6589_v14 }
 0x49b   : > { %4692 = vmatpush3.msra.mxu1 %v5988_v7 }
 0x49c   : > { %4693 = vmatprep.subr.mxu1 %v6589_v14 }
 0x49d   : > { %4694 = vmatpush3.msra.mxu1 %v5990_v8 }
 0x49e   : > { %4717 = vmatprep.subr.mxu1 %v6589_v14 }
 0x522   : > { %v2356_v34 = vpop.f32.mrf.mxu0 }
 0x524   : > { %v4602_v46 = vpop.f32.mrf.mxu0 }
 0x52a   : > { %v2245_v13 = vpop.f32.mrf.mxu1 }
 0x52b   : > { %v2357_v28 = vadd.f32 %v2356_v34, %v2245_v13 }
 0x52c   : > { %v4583_v53 = vpop.f32.mrf.mxu1 }
 0x532   : > { %v2525_v52 = vpop.f32.mrf.mxu0 }
 0x534   : > { %v4640_v60 = vpop.f32.mrf.mxu0 }
 0x53b   : > { %v2444_v61 = vpop.f32.mrf.mxu1 }
 0x53c   : > { %v2445_v17 = vadd.f32 %v2444_v61, %v2357_v28 }
 0x53d   : > { %v4621_v62 = vpop.f32.mrf.mxu1 }
 0x53e   : > { %v2526_v3 = vadd.f32 %v2525_v52, %v2445_v17 }
 0x544   : > { %v2699_v55 = vpop.f32.mrf.mxu0 }
 0x546   : > { %v4678_v0 = vpop.f32.mrf.mxu0 }
 0x54c   : > { %v2620_v1 = vpop.f32.mrf.mxu1 }
 0x54d   : > { %v2621_v2 = vadd.f32 %v2620_v1, %v2526_v3 }
 0x54e   : > { %v4659_v27 = vpop.f32.mrf.mxu1 }
 0x54f   : > { %v2700_v44 = vadd.f32 %v2699_v55, %v2621_v2 }
 0x551   : > { %v2706_v9 = vrot.slane %v2700_v44, %v5750_v31 }
 0x553   : > { %v6209_v20 = vsub.f32 %v6060_v19, %v2706_v9  ;;  %v6212_v37 = vsub.f32 %v6064_v63, %v2706_v9  ;;  %v6215_v26 = vsub.f32 %v6062_v21, %v2706_v9  ;;  %v6218_v18 = vsub.f32 %v6068_v36, %v2706_v9 }
 0x554   : > { %v6221_v33 = vsub.f32 %v6074_v12, %v2706_v9  ;;  %v6230_v63 = vsub.f32 %v6082_v39, %v2706_v9  ;;  %v6237_v56 = vsub.f32 %v6078_v58, %v2706_v9  ;;  %v6243_v39 = vsub.f32 %v6084_v42, %v2706_v9 }
 0x555   : > { %v2715_v22 = vmul.f32 %v6209_v20, %v6209_v20  ;;  %v2716_v6 = vmul.f32 %v6212_v37, %v6212_v37  ;;  %v2717_v19 = vmul.f32 %v6215_v26, %v6215_v26  ;;  %v2718_v21 = vmul.f32 %v6218_v18, %v6218_v18 }
 0x556   : > { %v2719_v45 = vmul.f32 %v6221_v33, %v6221_v33  ;;  %v2720_v46 = vmul.f32 %v6230_v63, %v6230_v63  ;;  %v2721_v52 = vmul.f32 %v6237_v56, %v6237_v56  ;;  %v2722_v61 = vmul.f32 %v6243_v39, %v6243_v39 }
 0x557   : > { %v2723_v36 = vsel %vm2141_vm6, %v2715_v22, 0.0  ;;  %v2724_v12 = vsel %vm2141_vm6, %v2716_v6, 0.0  ;;  %v2726_v51 = vsel %vm2141_vm6, %v2717_v19, 0.0  ;;  %v2728_v13 = vsel %vm2141_vm6, %v2718_v21, 0.0 }
 0x558   : > { %v2725_v41 = vadd.f32 %v2724_v12, %v2723_v36  ;;  %v2730_v58 = vsel %vm2141_vm6, %v2719_v45, 0.0  ;;  %v2732_v62 = vsel %vm2141_vm6, %v2720_v46, 0.0  ;;  %v2734_v42 = vsel %vm2141_vm6, %v2721_v52, 0.0  ;;  %v4133_v52 = vld [vmem:[#allocation8] ss:$0 sm:$0xff] }
 0x559   : > { %v2736_v0 = vsel %vm2141_vm6, %v2722_v61, 0.0 }
 0x55a   : > { %v2727_v34 = vadd.f32 %v2726_v51, %v2725_v41 }
 0x55c   : > { %v2729_v53 = vadd.f32 %v2728_v13, %v2727_v34  ;;  %v2131_v34 = vld [vmem:[%s6518_s6] sm:$0x1] }
 0x55e   : > { %v2731_v60 = vadd.f32 %v2730_v58, %v2729_v53 }
 0x560   : > { %v2733_v55 = vadd.f32 %v2732_v62, %v2731_v60 }
 0x562   : > { %v2735_v28 = vadd.f32 %v2734_v42, %v2733_v55 }
 0x564   : > { %v2737_v17 = vadd.f32 %v2736_v0, %v2735_v28 }
 0x566   : > { %v2738_v3 = vrot.slane %v2737_v17, 4 }
 0x568   : > { %v2739_v1 = vadd.f32 %v2738_v3, %v2737_v17 }
 0x56a   : > { %v2740_v2 = vrot.slane %v2739_v1, 2 }
 0x56c   : > { %v2741_v27 = vadd.f32 %v2740_v2, %v2739_v1 }
 0x56e   : > { %v2742_v44 = vrot.slane %v2741_v27, 1 }
 0x570   : > { %v2743_v9 = vadd.f32 %v2742_v44, %v2741_v27 }
 0x572   : > { %v2745_v22 = vsel %vm2141_vm6, %v2743_v9, 0 }
 0x573   : > { %v6257_v6 = vand.u32 4294901760, %v2745_v22 }
 0x575   : > { %v2821_v19 = vsub.f32 %v2745_v22, %v6257_v6  ;;  %4715 = vmatmul.mubr.f32.vlgmr.msra.gmra.mxu0 %v6257_v6 }
 0x576   : > { %4737 = vmatpush3.msra.mxu0 %v5929_v4  ;;  %4752 = vmatprep.mubr.msk.f32.mxu0 %vm5330_vm0, %v6589_v14 }
 0x577   : > { %4738 = vmatprep.subr.mxu0 %v6589_v14  ;;  %v2822_v21 = vand.u32 4294901760, %v2821_v19 }
 0x578   : > { %4739 = vmatpush3.msra.mxu0 %v5934_v11 }
 0x579   : > { %4740 = vmatprep.subr.mxu0 %v6589_v14  ;;  %v2823_v36 = vsub.f32 %v2821_v19, %v2822_v21 }
 0x57a   : > { %4741 = vmatpush3.msra.mxu0 %v5944_v25 }
 0x57b   : > { %4742 = vmatprep.subr.mxu0 %v6589_v14  ;;  %v2824_v12 = vand.u32 4294901760, %v2823_v36 }
 0x57c   : > { %4743 = vmatpush3.msra.mxu0 %v5956_v35 }
 0x57d   : > { %4744 = vmatprep.subr.mxu0 %v6589_v14  ;;  %4696 = vmatmul.mubr.f32.vlgmr.msra.gmra.mxu1 %v2824_v12 }
 0x57e   : > { %4718 = vmatpush3.msra.mxu1 %v5932_v10  ;;  %4745 = vmatpush3.msra.mxu0 %v5971_v43  ;;  %v4975_v10 = vld [vmem:[#allocation11 + $0x18] sm:$0xff]  }
 0x57f   : > { %4719 = vmatprep.subr.mxu1 %v6589_v14  ;;  %4746 = vmatprep.subr.mxu0 %v6589_v14 }
 0x580   : > { %4720 = vmatpush3.msra.mxu1 %v5942_v24  ;;  %4747 = vmatpush3.msra.mxu0 %v5982_v54  ;;  %v4978_v24 = vld [vmem:[#allocation11 + $0x28] sm:$0xff]  }
 0x581   : > { %4721 = vmatprep.subr.mxu1 %v6589_v14  ;;  %4748 = vmatprep.subr.mxu0 %v6589_v14 }
 0x582   : > { %4722 = vmatpush3.msra.mxu1 %v5954_v32  ;;  %4749 = vmatpush3.msra.mxu0 %v5988_v7  ;;  %v4981_v32 = vld [vmem:[#allocation11] sm:$0xff]  }
 0x583   : > { %4723 = vmatprep.subr.mxu1 %v6589_v14  ;;  %4750 = vmatprep.subr.mxu0 %v6589_v14 }
 0x584   : > { %4724 = vmatpush3.msra.mxu1 %v5968_v40  ;;  %4751 = vmatpush3.msra.mxu0 %v5990_v8 }
 0x585   : > { %4725 = vmatprep.subr.mxu1 %v6589_v14  ;;  %4753 = vmatmul.mubr.f32.vlgmr.msra.gmra.mxu0 %v2822_v21 }
 0x586   : > { %4774 = vmatprep.subr.mxu0 %v6589_v14  ;;  %4726 = vmatpush3.msra.mxu1 %v5986_v5 }
 0x587   : > { %4775 = vmatpush3.msra.mxu0 %v5929_v4  ;;  %4727 = vmatprep.subr.mxu1 %v6589_v14  ;;  %v4974_v4 = vld [vmem:[#allocation11 + $0x38] sm:$0xff]  }
 0x588   : > { %4776 = vmatprep.subr.mxu0 %v6589_v14  ;;  %4728 = vmatpush3.msra.mxu1 %v5999_v15 }
 0x589   : > { %4777 = vmatpush3.msra.mxu0 %v5934_v11  ;;  %4729 = vmatprep.subr.mxu1 %v6589_v14  ;;  %v4976_v11 = vld [vmem:[#allocation11 + $0x30] sm:$0xff]  }
 0x58a   : > { %4778 = vmatprep.subr.mxu0 %v6589_v14  ;;  %4730 = vmatpush3.msra.mxu1 %v6007_v48 }
 0x58b   : > { %4779 = vmatpush3.msra.mxu0 %v5944_v25  ;;  %4731 = vmatprep.subr.mxu1 %v6589_v14  ;;  %v4979_v25 = vld [vmem:[#allocation11 + $0x8] sm:$0xff]  }
 0x58c   : > { %4780 = vmatprep.subr.mxu0 %v6589_v14  ;;  %4732 = vmatpush3.msra.mxu1 %v6010_v50 }
 0x58d   : > { %4733 = vmatprep.mubr.msk.f32.mxu1 %vm5330_vm0, %v6589_v14  ;;  %4781 = vmatpush3.msra.mxu0 %v5956_v35  ;;  %v6333_v35 = vld [vmem:[#allocation11 + $0x58] sm:$0xff]  }
 0x58e   : > { %4734 = vmatmul.mubr.f32.vlgmr.msra.gmra.mxu1 %v2821_v19  ;;  %4755 = vmatprep.subr.mxu1 %v6589_v14 }
 0x58f   : > { %4782 = vmatprep.subr.mxu0 %v6589_v14  ;;  %4756 = vmatpush3.msra.mxu1 %v5939_v23  ;;  %v4977_v23 = vld [vmem:[#allocation11 + $0x10] sm:$0xff]  }
 0x590   : > { %4783 = vmatpush3.msra.mxu0 %v5971_v43  ;;  %4757 = vmatprep.subr.mxu1 %v6589_v14 }
 0x591   : > { %4784 = vmatprep.subr.mxu0 %v6589_v14  ;;  %4758 = vmatpush3.msra.mxu1 %v5951_v30  ;;  %v4980_v30 = vld [vmem:[#allocation11 + $0x20] sm:$0xff]  }
 0x592   : > { %4785 = vmatpush3.msra.mxu0 %v5982_v54  ;;  %4759 = vmatprep.subr.mxu1 %v6589_v14 }
 0x593   : > { %4786 = vmatprep.subr.mxu0 %v6589_v14  ;;  %4760 = vmatpush3.msra.mxu1 %v5965_v38  ;;  %v6339_v38 = vld [vmem:[%s6523_s11 + $0x8] sm:$0xff]  }
 0x594   : > { %4787 = vmatpush3.msra.mxu0 %v5988_v7  ;;  %4761 = vmatprep.subr.mxu1 %v6589_v14 }
 0x595   : > { %4788 = vmatprep.subr.mxu0 %v6589_v14  ;;  %4762 = vmatpush3.msra.mxu1 %v5980_v59 }
 0x596   : > { %4789 = vmatpush3.msra.mxu0 %v5990_v8  ;;  %4790 = vmatprep.mubr.msk.f32.mxu0 %vm5330_vm0, %v6589_v14 }
 0x597   : > { %4763 = vmatprep.subr.mxu1 %v6589_v14  ;;  %4791 = vmatmul.mubr.f32.vlgmr.msra.gmra.mxu0 %v6257_v6 }
 0x598   : > { %4764 = vmatpush3.msra.mxu1 %v6004_v16  ;;  %4771 = vmatprep.mubr.msk.f32.mxu1 %vm5330_vm0, %v6589_v14 }
 0x599   : > { %4765 = vmatprep.subr.mxu1 %v6589_v14  ;;  %4809 = vmatprep.subr.bf16.mxu0 %v4975_v10 }
 0x59a   : > { %4766 = vmatpush3.msra.mxu1 %v6017_v57  ;;  %4810 = vmatpush3.bf16.msra.mxu0 %v4975_v10 }
 0x59b   : > { %4767 = vmatprep.subr.mxu1 %v6589_v14  ;;  %4811 = vmatprep.subr.bf16.mxu0 %v4977_v23 }
 0x59c   : > { %4768 = vmatpush3.msra.mxu1 %v6024_v47 }
 0x59d   : > { %4769 = vmatprep.subr.mxu1 %v6589_v14 }
 0x59e   : > { %4770 = vmatpush3.msra.mxu1 %v6027_v49  ;;  %4812 = vmatpush3.bf16.msra.mxu0 %v4977_v23 }
 0x59f   : > { %4772 = vmatmul.mubr.f32.vlgmr.msra.gmra.mxu1 %v6257_v6  ;;  %4793 = vmatprep.subr.bf16.mxu1 %v4974_v4 }
 0x5a0   : > { %4794 = vmatpush3.bf16.msra.mxu1 %v4974_v4  ;;  %4813 = vmatprep.subr.bf16.mxu0 %v4979_v25 }
 0x5a1   : > { %4795 = vmatprep.subr.bf16.mxu1 %v4976_v11 }
 0x5a2   : > { %4814 = vmatpush3.bf16.msra.mxu0 %v4979_v25 }
 0x5a3   : > { %4815 = vmatprep.subr.bf16.mxu0 %v4981_v32 }
 0x5a4   : > { %4796 = vmatpush3.bf16.msra.mxu1 %v4976_v11 }
 0x5a5   : > { %4797 = vmatprep.subr.bf16.mxu1 %v4978_v24 }
 0x5a6   : > { %4816 = vmatpush3.bf16.msra.mxu0 %v4981_v32 }
 0x5a7   : > { %4841 = vmatprep.subr.bf16.mxu0 %v6339_v38 }
 0x5a8   : > { %4798 = vmatpush3.bf16.msra.mxu1 %v4978_v24 }
 0x5a9   : > { %4799 = vmatprep.subr.bf16.mxu1 %v4980_v30 }
 0x5ac   : > { %4800 = vmatpush3.bf16.msra.mxu1 %v4980_v30 }
 0x5ad   : > { %4825 = vmatprep.subr.bf16.mxu1 %v6333_v35 }
 0x635   : > { %v2937_v40 = vpop.f32.mrf.mxu0 }
 0x637   : > { %v4716_v43 = vpop.f32.mrf.mxu0 }
 0x63d   : > { %v2826_v59 = vpop.f32.mrf.mxu1 }
 0x63e   : > { %v2827_v16 = vadd.f32 1e-05, %v2826_v59 }
 0x63f   : > { %v4697_v54 = vpop.f32.mrf.mxu1 }
 0x640   : > { %v2938_v50 = vadd.f32 %v2937_v40, %v2827_v16 }
 0x645   : > { %v3106_v5 = vpop.f32.mrf.mxu0 }
 0x647   : > { %v4754_v7 = vpop.f32.mrf.mxu0 }
 0x64e   : > { %v3025_v8 = vpop.f32.mrf.mxu1 }
 0x64f   : > { %v3026_v47 = vadd.f32 %v3025_v8, %v2938_v50 }
 0x650   : > { %v4735_v15 = vpop.f32.mrf.mxu1 }
 0x651   : > { %v3107_v49 = vadd.f32 %v3106_v5, %v3026_v47 }
 0x657   : > { %v3280_v48 = vpop.f32.mrf.mxu0 }
 0x659   : > { %v4792_v57 = vpop.f32.mrf.mxu0 }
 0x65f   : > { %v3201_v14 = vpop.f32.mrf.mxu1 }
 0x660   : > { %v3202_v41 = vadd.f32 %v3201_v14, %v3107_v49 }
 0x661   : > { %v4773_v45 = vpop.f32.mrf.mxu1 }
 0x662   : > { %v3281_v51 = vadd.f32 %v3280_v48, %v3202_v41 }
 0x664   : > { %5022 = vrsqrt.f32 %v3281_v51 }
 0x671   : > { %v5023_v46 = vpop.eup %5022 }
 0x672   : > { %v3285_v13 = vmul.f32 %v5023_v46, %v2131_v34  ;;  %v4984_v46 = vld [vmem:[#allocation11 + $0x50] sm:$0xff]  }
 0x674   : > { %v3289_v53 = vrot.slane %v3285_v13, %v5750_v31 }
 0x676   : > { %v3290_v58 = vmul.f32 %v3289_v53, %v6209_v20  ;;  %v3291_v60 = vmul.f32 %v3289_v53, %v6212_v37  ;;  %v3292_v61 = vmul.f32 %v3289_v53, %v6215_v26  ;;  %v3293_v62 = vmul.f32 %v3289_v53, %v6218_v18 }
 0x677   : > { %v3294_v55 = vmul.f32 %v3289_v53, %v6221_v33  ;;  %v3295_v42 = vmul.f32 %v3289_v53, %v6230_v63  ;;  %v3297_v28 = vmul.f32 %v3289_v53, %v6243_v39  ;;  %v3296_v0 = vmul.f32 %v3289_v53, %v6237_v56 }
 0x678   : > { %v3304_v17 = vadd.f32 %v4133_v52, %v3290_v58  ;;  %v3305_v3 = vadd.f32 %v4133_v52, %v3291_v60  ;;  %v3306_v31 = vadd.f32 %v4133_v52, %v3292_v61  ;;  %v3307_v1 = vadd.f32 %v4133_v52, %v3293_v62 }
 0x679   : > { %v3308_v2 = vadd.f32 %v4133_v52, %v3294_v55  ;;  %v3309_v20 = vadd.f32 %v4133_v52, %v3295_v42  ;;  %v3311_v26 = vadd.f32 %v4133_v52, %v3297_v28  ;;  %v6354_v18 = vadd.f32 %v4133_v52, %v3296_v0 }
 0x67a   : > { %v4134_v27 = vmul.f32 -1.442695, %v3304_v17  ;;  %v4135_v37 = vmul.f32 -1.442695, %v3305_v3  ;;  %v4136_v44 = vmul.f32 -1.442695, %v3306_v31 }
 0x67b   : > { %v4137_v9 = vmul.f32 -1.442695, %v3307_v1  ;;  %v4138_v33 = vmul.f32 -1.442695, %v3308_v2  ;;  %v4139_v63 = vmul.f32 -1.442695, %v3309_v20 }
 0x67c   : > { %5024 = vpow2.f32 %v4134_v27  ;;  %v4141_v39 = vmul.f32 -1.442695, %v3311_v26  ;;  %v4140_v56 = vmul.f32 -1.442695, %v6354_v18 }
 0x67d   : > { %5026 = vpow2.f32 %v4135_v37 }
 0x67e   : > { %5028 = vpow2.f32 %v4136_v44 }
 0x67f   : > { %5030 = vpow2.f32 %v4137_v9 }
 0x680   : > { %5032 = vpow2.f32 %v4138_v33 }
 0x681   : > { %5034 = vpow2.f32 %v4139_v63 }
 0x682   : > { %5036 = vpow2.f32 %v4141_v39  ;;  %v4986_v39 = vld [vmem:[%s6523_s11] sm:$0xff]  }
 0x683   : > { %5038 = vpow2.f32 %v4140_v56 }
 0x689   : > { %v5025_v22 = vpop.eup %5024 }
 0x68a   : > { %v5027_v6 = vpop.eup %5026  ;;  %v3336_v19 = vadd.f32 1.0, %v5025_v22  ;;  %v4987_v22 = vld [vmem:[#allocation11 + $0x40] sm:$0xff]  }
 0x68b   : > { %v5029_v21 = vpop.eup %5028  ;;  %v3337_v36 = vadd.f32 1.0, %v5027_v6 }
 0x68c   : > { %v5031_v12 = vpop.eup %5030  ;;  %5040 = vrcp.f32 %v3336_v19  ;;  %v3338_v4 = vadd.f32 1.0, %v5029_v21 }
 0x68d   : > { %v5033_v10 = vpop.eup %5032  ;;  %5042 = vrcp.f32 %v3337_v36  ;;  %v3339_v11 = vadd.f32 1.0, %v5031_v12 }
 0x68e   : > { %v5035_v23 = vpop.eup %5034  ;;  %5044 = vrcp.f32 %v3338_v4  ;;  %v3340_v24 = vadd.f32 1.0, %v5033_v10 }
 0x68f   : > { %v5037_v25 = vpop.eup %5036  ;;  %5046 = vrcp.f32 %v3339_v11  ;;  %v3341_v30 = vadd.f32 1.0, %v5035_v23 }
 0x690   : > { %v5039_v32 = vpop.eup %5038  ;;  %5048 = vrcp.f32 %v3340_v24  ;;  %v3343_v40 = vadd.f32 1.0, %v5037_v25 }
 0x691   : > { %5050 = vrcp.f32 %v3341_v30  ;;  %v3342_v43 = vadd.f32 1.0, %v5039_v32  ;;  %v6590_v32 = vld [vmem:[#allocation21_spill] sm:$0xff] }
 0x692   : > { %5052 = vrcp.f32 %v3343_v40  ;;  %v6591_v40 = vld [vmem:[#allocation22_spill] sm:$0xff] }
 0x693   : > { %5054 = vrcp.f32 %v3342_v43  ;;  %v3780_v43 = vpack.c.bf16 %v6591_v40, %v6590_v32 }
 0x699   : > { %v5041_v59 = vpop.eup %5040 }
 0x69a   : > { %v5043_v54 = vpop.eup %5042  ;;  %v6357_v5 = vmul.f32 %v5041_v59, %v3304_v17 }
 0x69b   : > { %v5045_v7 = vpop.eup %5044  ;;  %v3361_v8 = vmul.f32 %v5043_v54, %v3305_v3 }
 0x69c   : > { %v5047_v15 = vpop.eup %5046  ;;  %v6359_v16 = vmul.f32 %v5045_v7, %v3306_v31  ;;  %v3373_v51 = vrot.slane %v6357_v5, 7  ;;  %v3401_v42 = vrot.slane %v6357_v5, 1  ;;  %v4985_v31 = vld [vmem:[#allocation11 + $0x48] sm:$0xff]  }
 0x69d   : > { %v5049_v48 = vpop.eup %5048  ;;  %v3369_v50 = vpack.c.bf16 %v3361_v8, %v6357_v5  ;;  %v6362_v57 = vmul.f32 %v5047_v15, %v3307_v1  ;;  %v3374_v34 = vrot.slane %v3361_v8, 7  ;;  %v3402_v28 = vrot.slane %v3361_v8, 1 }
 0x69e   : > { %v5051_v47 = vpop.eup %5050  ;;  %v6364_v49 = vmul.f32 %v5049_v48, %v3308_v2  ;;  %v3375_v52 = vrot.slane %v6359_v16, 7  ;;  %v3403_v0 = vrot.slane %v6359_v16, 1  ;;  %v6594_v48 = vld [vmem:[#allocation24_spill] sm:$0xff] }
 0x69f   : > { %v5053_v14 = vpop.eup %5052  ;;  %4801 = vmatprep.mubr.msk.bf16.mxu1 %vm2141_vm6, %v3369_v50  ;;  %v3370_v41 = vpack.c.bf16 %v6362_v57, %v6359_v16  ;;  %v3365_v45 = vmul.f32 %v5051_v47, %v3309_v20  ;;  %v3376_v58 = vrot.slane %v6362_v57, 7  ;;  %v3387_v17 = vsel %vm1746_vm2, %v3373_v51, %v3374_v34  ;;  %v6593_v16 = vld [vmem:[#allocation23_spill] sm:$0xff]  ;;  %v6596_v47 = vld [vmem:[#allocation26_spill] sm:$0xff] }
 0x6a0   : > { %v5055_v13 = vpop.eup %5054  ;;  %v6370_v53 = vmul.f32 %v5053_v14, %v3311_v26  ;;  %v3377_v61 = vrot.slane %v6364_v49, 7  ;;  %v3386_v2 = vsel %vm1746_vm2, %v3374_v34, %v3375_v52  ;;  %v3414_v26 = vsel %vm1791_vm3, %v3402_v28, %v3403_v0 }
 0x6a1   : > { %4802 = vmatmul.mubr.msk.bf16.vlgmr.msra.gmra.mxu1 %vm2141_vm6, %v3370_v41  ;;  %v3371_v60 = vpack.c.bf16 %v3365_v45, %v6364_v49  ;;  %v3378_v62 = vrot.slane %v3365_v45, 7  ;;  %v3366_v3 = vmul.f32 %v5055_v13, %v6354_v18  ;;  %v3415_v9 = vsel %vm1791_vm3, %v3401_v42, %v3402_v28  ;;  %v6597_v41 = vld [vmem:[#allocation27_spill] sm:$0xff] }
 0x6a2   : > { %4826 = vmatpush3.bf16.msra.mxu1 %v6333_v35  ;;  %v3380_v55 = vrot.slane %v6370_v53, 7  ;;  %v3385_v35 = vsel %vm1746_vm2, %v3375_v52, %v3376_v58  ;;  %v3384_v37 = vsel %vm1746_vm2, %v3376_v58, %v3377_v61  ;;  %v3404_v6 = vrot.slane %v6362_v57, 1  ;;  %v6595_v57 = vld [vmem:[#allocation25_spill] sm:$0xff] }
 0x6a3   : > { %4805 = vmatprep.mubr.msk.bf16.mxu1 %vm2141_vm6, %v3371_v60  ;;  %4827 = vmatprep.subr.bf16.mxu1 %v4984_v46  ;;  %v3383_v27 = vsel %vm1746_vm2, %v3377_v61, %v3378_v62  ;;  %v3398_v18 = vpack.c.bf16 %v3385_v35, %v3386_v2  ;;  %v3372_v33 = vpack.c.bf16 %v6370_v53, %v3366_v3  ;;  %v3379_v56 = vrot.slane %v3366_v3, 7 }
 0x6a4   : > { %v3388_v1 = vsel %vm1746_vm2, %v3380_v55, %v3373_v51  ;;  %v3399_v63 = vpack.c.bf16 %v3383_v27, %v3384_v37  ;;  %v3405_v19 = vrot.slane %v6364_v49, 1  ;;  %v3425_v21 = vpack.c.bf16 %v3414_v26, %v3415_v9  ;;  %v4166_v26 = vld [vmem:[#allocation13] ss:$0 sm:$0xff]  ;;  %v4167_v9 = vld [vmem:[%s6599_s23] ss:$0 sm:$0xff] }
 0x6a5   : > { %v3389_v20 = vsel %vm588_vm4, %v3388_v1, 0.0  ;;  %v3406_v36 = vrot.slane %v3365_v45, 1  ;;  %v3407_v12 = vrot.slane %v3366_v3, 1  ;;  %v3381_v4 = vsel %vm1746_vm2, %v3379_v56, %v3380_v55  ;;  %v6598_v45 = vld [vmem:[#allocation28_spill] sm:$0xff] }
 0x6a6   : > { %v3397_v44 = vpack.c.bf16 %v3387_v17, %v3389_v20  ;;  %4828 = vmatpush3.bf16.msra.mxu1 %v4984_v46  ;;  %v3382_v10 = vsel %vm1746_vm2, %v3378_v62, %v3379_v56  ;;  %v3413_v11 = vsel %vm1791_vm3, %v3403_v0, %v3404_v6  ;;  %v3408_v25 = vrot.slane %v6370_v53, 1 }
 0x6a7   : > { %4829 = vmatprep.subr.bf16.mxu1 %v4985_v31  ;;  %v3410_v23 = vsel %vm1791_vm3, %v3406_v36, %v3407_v12  ;;  %v3411_v24 = vsel %vm1791_vm3, %v3405_v19, %v3406_v36  ;;  %v3400_v30 = vpack.c.bf16 %v3381_v4, %v3382_v10  ;;  %v3781_v50 = vpack.c.bf16 %v6594_v48, %v6593_v16 }
 0x6a8   : > { %4817 = vmatprep.mubr.msk.bf16.mxu0 %vm2141_vm6, %v3397_v44  ;;  %v3427_v54 = vpack.c.bf16 %v3410_v23, %v3411_v24  ;;  %v3416_v5 = vsel %vm1791_vm3, %v3408_v25, %v3401_v42  ;;  %v3409_v7 = vsel %vm1791_vm3, %v3407_v12, %v3408_v25  ;;  %v3782_v49 = vpack.c.bf16 %v6596_v47, %v6595_v57 }
 0x6a9   : > { %4818 = vmatmul.mubr.msk.bf16.vlgmr.msra.gmra.mxu0 %vm2141_vm6, %v3398_v18  ;;  %4806 = vmatmul.mubr.msk.bf16.gmra.mxu1 %vm2141_vm6, %v3372_v33  ;;  %v3424_v15 = vsel %vm603_vm5, %v3416_v5, 0.0  ;;  %v3783_v29 = vpack.c.bf16 %v6598_v45, %v6597_v41 }
 0x6aa   : > { %4842 = vmatpush3.bf16.msra.mxu0 %v6339_v38  ;;  %4821 = vmatprep.mubr.msk.bf16.mxu0 %vm2141_vm6, %v3399_v63  ;;  %v3412_v38 = vsel %vm1791_vm3, %v3404_v6, %v3405_v19  ;;  %v3428_v14 = vpack.c.bf16 %v3424_v15, %v3409_v7 }
 0x6ab   : > { %4830 = vmatpush3.bf16.msra.mxu1 %v4985_v31  ;;  %4833 = vmatprep.mubr.msk.bf16.mxu1 %vm2141_vm6, %v3425_v21  ;;  %v3426_v59 = vpack.c.bf16 %v3412_v38, %v3413_v11 }
 0x6ac   : > { %4843 = vmatprep.subr.bf16.mxu0 %v4986_v39  ;;  %4831 = vmatprep.subr.bf16.mxu1 %v4987_v22 }
 0x6ae   : > { %4844 = vmatpush3.bf16.msra.mxu0 %v4986_v39 }
 0x6af   : > { %4832 = vmatpush3.bf16.msra.mxu1 %v4987_v22 }
 0x6b1   : > { %4822 = vmatmul.mubr.msk.bf16.gmra.mxu0 %vm2141_vm6, %v3400_v30 }
 0x6b2   : > { %4845 = vmatprep.mubr.msk.bf16.mxu0 %vm610_vm1, %v3780_v43  ;;  %4834 = vmatmul.mubr.msk.bf16.vlgmr.msra.gmra.mxu1 %vm2141_vm6, %v3426_v59 }
 0x6b3   : > { %4837 = vmatprep.mubr.msk.bf16.mxu1 %vm2141_vm6, %v3427_v54 }
 0x6b9   : > { %4846 = vmatmul.mubr.msk.bf16.vlgmr.msra.gmra.mxu0 %vm610_vm1, %v3781_v50 }
 0x6ba   : > { %4849 = vmatprep.mubr.msk.bf16.mxu0 %vm610_vm1, %v3782_v49  ;;  %4838 = vmatmul.mubr.msk.bf16.gmra.mxu1 %vm2141_vm6, %v3428_v14 }
 0x6c1   : > { %4850 = vmatmul.mubr.msk.bf16.gmra.mxu0 %vm610_vm1, %v3783_v29 }
 0x761   : > { %v4803_v51 = vpop.f32.mrf.mxu1 }
 0x763   : > { %v3516_v34 = vpop.f32.mrf.mxu1 }
 0x765   : > { %v4804_v46 = vpop.f32.mrf.mxu1 }
 0x767   : > { %v3519_v13 = vpop.f32.mrf.mxu1 }
 0x769   : > { %v4819_v53 = vpop.f32.mrf.mxu0  ;;  %v4807_v52 = vpop.f32.mrf.mxu1 }
 0x76a   : > { %v3626_v63 = vadd.f32 %v4819_v53, %v4803_v51 }
 0x76b   : > { %v3617_v58 = vpop.f32.mrf.mxu0  ;;  %v3532_v60 = vpop.f32.mrf.mxu1 }
 0x76c   : > { %v3618_v1 = vadd.f32 %v3617_v58, %v3516_v34 }
 0x76d   : > { %v4820_v61 = vpop.f32.mrf.mxu0  ;;  %v6448_v62 = vpop.f32.mrf.mxu1 }
 0x76e   : > { %v3629_v36 = vadd.f32 %v4820_v61, %v4804_v46 }
 0x76f   : > { %v3620_v55 = vpop.f32.mrf.mxu0  ;;  %v3535_v42 = vpop.f32.mrf.mxu1 }
 0x770   : > { %v3621_v44 = vadd.f32 %v3620_v55, %v3519_v13 }
 0x771   : > { %v4823_v28 = vpop.f32.mrf.mxu0 }
 0x772   : > { %v4835_v0 = vpop.f32.mrf.mxu1  ;;  %v3642_v29 = vadd.f32 %v4823_v28, %v4807_v52 }
 0x773   : > { %v3633_v17 = vpop.f32.mrf.mxu0  ;;  %v3760_v19 = vadd.f32 %v4835_v0, %v3626_v63 }
 0x774   : > { %v3727_v3 = vpop.f32.mrf.mxu1  ;;  %v3634_v59 = vadd.f32 %v3633_v17, %v3532_v60 }
 0x775   : > { %v4824_v31 = vpop.f32.mrf.mxu0  ;;  %v3758_v20 = vadd.f32 %v3727_v3, %v3618_v1  ;;  %v3774_v25 = vadd.f32 %v4166_v26, %v3760_v19 }
 0x776   : > { %v4836_v35 = vpop.f32.mrf.mxu1  ;;  %v3645_v58 = vadd.f32 %v4824_v31, %v6448_v62 }
 0x777   : > { %v3636_v2 = vpop.f32.mrf.mxu0  ;;  %v3772_v22 = vadd.f32 %v4166_v26, %v3758_v20  ;;  %v3761_v30 = vadd.f32 %v4836_v35, %v3629_v36 }
 0x778   : > { %v3730_v27 = vpop.f32.mrf.mxu1  ;;  %v3637_v50 = vadd.f32 %v3636_v2, %v3535_v42 }
 0x779   : > { %v4847_v37 = vpop.f32.mrf.mxu0  ;;  %v3759_v39 = vadd.f32 %v3730_v27, %v3621_v44  ;;  %v3775_v15 = vadd.f32 %v4166_v26, %v3761_v30 }
 0x77a   : > { %v4839_v33 = vpop.f32.mrf.mxu1  ;;  %v3862_v10 = vadd.f32 %v4847_v37, %v4167_v9 }
 0x77b   : > { %v3853_v18 = vpop.f32.mrf.mxu0  ;;  %v3773_v11 = vadd.f32 %v4166_v26, %v3759_v39  ;;  %v3764_v13 = vadd.f32 %v4839_v33, %v3642_v29 }
 0x77c   : > { %v3854_v56 = vadd.f32 %v4167_v9, %v3853_v18  ;;  %v3743_v12 = vpop.f32.mrf.mxu1  ;;  %v3886_v7 = vadd.f32 %v3862_v10, %v3774_v25 }
 0x77d   : > { %v4848_v6 = vpop.f32.mrf.mxu0  ;;  %v3762_v16 = vadd.f32 %v3743_v12, %v3634_v59  ;;  %v3778_v42 = vadd.f32 %v4166_v26, %v3764_v13 }
 0x77e   : > { %v3884_v21 = vadd.f32 %v3854_v56, %v3772_v22  ;;  %v4840_v40 = vpop.f32.mrf.mxu1  ;;  %v3865_v54 = vadd.f32 %v4848_v6, %v4167_v9  ;;  %v3894_v47 = vmul.f32 0.7, %v3886_v7 }
 0x77f   : > { %v3856_v4 = vpop.f32.mrf.mxu0  ;;  %v3776_v41 = vadd.f32 %v4166_v26, %v3762_v16  ;;  %v3765_v0 = vadd.f32 %v4840_v40, %v3645_v58 }
 0x780   : > { %v3857_v38 = vadd.f32 %v4167_v9, %v3856_v4  ;;  %v3892_v23 = vmul.f32 0.7, %v3884_v21  ;;  %v3746_v48 = vpop.f32.mrf.mxu1  ;;  %v3887_v49 = vadd.f32 %v3865_v54, %v3775_v15 }
 0x781   : > { %v4851_v24 = vpop.f32.mrf.mxu0  ;;  %v3763_v45 = vadd.f32 %v3746_v48, %v3637_v50  ;;  %v3779_v35 = vadd.f32 %v4166_v26, %v3765_v0 }
 0x782   : > { %3900 = vxpose.xlu1.b32.start [1/8] (short) (narrow) %v3892_v23, 64  ;;  %v3885_v32 = vadd.f32 %v3857_v38, %v3773_v11  ;;  %v3895_v34 = vmul.f32 0.7, %v3887_v49  ;;  %v3878_v60 = vadd.f32 %v4851_v24, %v4167_v9 }
 0x783   : > { %v3869_v43 = vpop.f32.mrf.mxu0  ;;  %v3777_v53 = vadd.f32 %v4166_v26, %v3763_v45 }
 0x784   : > { %v3893_v5 = vmul.f32 0.7, %v3885_v32  ;;  %v3870_v57 = vadd.f32 %v4167_v9, %v3869_v43  ;;  %v3890_v1 = vadd.f32 %v3878_v60, %v3778_v42 }
 0x785   : > { %v4852_v8 = vpop.f32.mrf.mxu0 }
 0x786   : > { %3901 = vxpose.xlu1.b32.cont [2/8] (short) (narrow) %v3893_v5, 64  ;;  %v3888_v46 = vadd.f32 %v3870_v57, %v3776_v41  ;;  %v3881_v17 = vadd.f32 %v4852_v8, %v4167_v9  ;;  %v3898_v52 = vmul.f32 0.7, %v3890_v1 }
 0x787   : > { %v3872_v14 = vpop.f32.mrf.mxu0 }
 0x788   : > { %v3873_v51 = vadd.f32 %v4167_v9, %v3872_v14  ;;  %v3896_v61 = vmul.f32 0.7, %v3888_v46  ;;  %v3891_v28 = vadd.f32 %v3881_v17, %v3779_v35 }
 0x78a   : > { %3902 = vxpose.xlu1.b32.cont [3/8] (short) (narrow) %v3894_v47, 64  ;;  %v3889_v55 = vadd.f32 %v3873_v51, %v3777_v53  ;;  %v3899_v2 = vmul.f32 0.7, %v3891_v28 }
 0x78c   : > { %v3897_v3 = vmul.f32 0.7, %v3889_v55 }
 0x78e   : > { %3903 = vxpose.xlu1.b32.cont [4/8] (short) (narrow) %v3895_v34, 64 }
 0x792   : > { %3904 = vxpose.xlu1.b32.cont [5/8] (short) (narrow) %v3896_v61, 64 }
 0x796   : > { %3905 = vxpose.xlu1.b32.cont [6/8] (short) (narrow) %v3897_v3, 64 }
 0x79a   : > { %3906 = vxpose.xlu1.b32.cont [7/8] (short) (narrow) %v3898_v52, 64 }
 0x79e   : > { %3907 = vxpose.xlu1.b32.end [8/8] (short) (narrow) %v3899_v2, 64 }
 0x7fe   : > { %v3916_v62 = vpop.trf.xlu1 }
 0x7ff   : > { %3932 = vst.msk [vmem:[%s541_s4] sm:$0xff] %vm2141_vm6, %v3916_v62 }
 0x802   : > { %v3917_v31 = vpop.trf.xlu1 }
 0x803   : > { %3933 = vst.msk [vmem:[%s541_s4 + $0x8] sm:$0xff] %vm2141_vm6, %v3917_v31 }
 0x806   : > { %v3918_v20 = vpop.trf.xlu1 }
 0x807   : > { %3934 = vst.msk [vmem:[%s541_s4 + $0x10] sm:$0xff] %vm2141_vm6, %v3918_v20 }
 0x80a   : > { %v3919_v27 = vpop.trf.xlu1 }
 0x80b   : > { %3935 = vst.msk [vmem:[%s541_s4 + $0x18] sm:$0xff] %vm2141_vm6, %v3919_v27 }
 0x80e   : > { %v3920_v37 = vpop.trf.xlu1 }
 0x80f   : > { %3936 = vst.msk [vmem:[%s541_s4 + $0x20] sm:$0xff] %vm2141_vm6, %v3920_v37 }
 0x812   : > { %v3921_v44 = vpop.trf.xlu1 }
 0x813   : > { %3937 = vst.msk [vmem:[%s541_s4 + $0x28] sm:$0xff] %vm2141_vm6, %v3921_v44 }
 0x816   : > { %v3922_v26 = vpop.trf.xlu1 }
 0x817   : > { %3938 = vst.msk [vmem:[%s541_s4 + $0x30] sm:$0xff] %vm2141_vm6, %v3922_v26 }
 0x81a   : > { %v3923_v9 = vpop.trf.xlu1 }
 0x81b   : > { %3939 = vst.msk [vmem:[%s541_s4 + $0x38] sm:$0xff] %vm2141_vm6, %v3923_v9 }
 0x81c   : > { %5253 = shalt.err (!%p5250_p6)
}
 0x81d   : > { %s5254_s17 = scalar_lea.hbm %s6468_s12, 1024  ;;  %s5258_s23 = scalar_lea.hbm %s6600_s24, 2048 }
 0x81e   : > { %p5255_p10 = scmp.ne.s32.totalorder %s6468_s12, %s5254_s17  ;;  %p5259_p2 = scmp.lt.s32.totalorder %s6468_s12, %s6600_s24 }
 0x81f   : > { %p5260_p5 = scmp.lt.s32.totalorder %s5258_s23, %s5254_s17 }
 0x820   : > { %p5256_p11 = pnand %p5255_p10, %p6601_p1 }
 0x821   : > { %p5261_p8 = por %p5260_p5, %p5259_p2 }
 0x822   : > { %p5257_p12 = pneg %p5256_p11 }
 0x824   : > { %p5262_p4 = pnand %p5261_p8, %p5257_p12 }
 0x826   : > { %5265 = shalt.err (!%p5262_p4)
}
 0x827   : > { %s5332_s8 = smov 128   ;;  %s5333_s9 = smov 8  }
 0x828   : > { %4879 = dma.vmem_to_hbm [thread:$0]  (%p6601_p1), %s6462_s7, 1024, %s6468_s12, %s3941_s16, %s5332_s8, %s5332_s8, %s5333_s9  }
 0x829 PF: > { %s3969_s15 = sand.u32 1, %s5304_s25   ;;  %p6602_p3 = scmp.ne.s32.totalorder %s6570_s19, 0 }
 0x82a   : > { %p6603_p9 = scmp.ge.s32.totalorder %s5316_s28, 2  ;;  %s3970_s13 = scalar_lea.sflag [#allocation4], %s3969_s15 }
 0x82c   : > { %p4905_p13 = pnand %p6603_p9, %p6602_p3 }
 0x82e   : > { %p4906_p0 = pneg %p4905_p13 }
 0x830   : > { %5299 = dma.done.wait (%p4906_p0), %s3970_s13, 1024  }
 0x831   : > { %5301 = vsyncadd (%p4906_p0), %s3970_s13, 4294966272  ;;  %s6604_s14 = sld [smem:[#allocation20_spill]]  ;;  %p29_p7 = scmp.ge.s32.totalorder %s5499_s18, 4  }
 0x832   : > { %s6605_s25 = smov %s5308_s26  ;;  %s6606_s26 = smov %s5312_s27 }
 0x833   : > { %s6608_s28 = smov %s5499_s18  ;;  %31 = sbr.rel (!%p29_p7) target bundleno = 17 (0x11), region = 145 }
 0x837   : > { %s6607_s27 = smov %s6604_s14 }
 0x838   :  { %3975 = vsyncpa [#allocation3], 1 }
 0x839   :  { %3977 = vsyncpa [#allocation3 + $0x1], 1 }
 0x83a   :  { %3978 = vsyncpa [#allocation6], 1 }
 0x83b   :  { %3979 = vsyncpa [#allocation9], 1 }
 0x83c   :  { %3980 = vsyncpa [#allocation12], 1 }
 0x83d   :  { %3981 = vsyncpa [#allocation4], 1 }
 0x83e   :  { %3983 = vsyncpa [#allocation4 + $0x1], 1 }

</bundles_post_ra>
